<compile_context>
chip_gen: v7x
topology: tpu7x:2x2x1
jax: 0.10.0
libtpu: 0.0.40
codegen_flags: <defaults>
</compile_context>

<pallas_src>
import functools

import jax
import jax.numpy as jnp
from jax.experimental import pallas as pl
from jax.experimental.pallas import tpu as pltpu


COMPUTE_DTYPE = jnp.bfloat16            # MXU-native input dtype
VMEM_LIMIT_BYTES = 48 * 1024 * 1024     # fits v7x (64 MiB); raise to ~96 MiB on v6e
ROW_TILE_TARGET = 256                   # 128 is also fine on v5e; 512 profitable on v6e


def _round_up(x, m):
    return (x + m - 1) // m * m


def _row_tile(m, target=ROW_TILE_TARGET):
    """Row tile; callers zero-pad M up to a multiple of the returned tile (never shrink)."""
    if m <= target:
        return max(8, _round_up(m, 8))
    # pick 256 or 128, whichever wastes less row padding (prefer the larger on a tie)
    return min((256, 128), key=lambda t: _round_up(m, t))


def _hidden_tile(h, target=2048):
    """MLP hidden-dim tile: bounds per-step weight slabs (v7x has only 64 MiB VMEM)."""
    if h <= target:
        return h
    for cand in (target, 1024, 512, 256, 128):
        if h % cand == 0:
            return cand
    return h


def _heads_per_step(num_heads, head_dim):
    """Smallest head group whose fused-QKV column block is 128-lane aligned."""
    for hpg in range(1, num_heads):
        if num_heads % hpg == 0 and (3 * head_dim * hpg) % 128 == 0:
            return hpg
    return num_heads  # full-width block (always a legal BlockSpec)


def _pad_rows(x, m_pad):
    m = x.shape[0]
    if m_pad == m:
        return x
    return jnp.pad(x, ((0, m_pad - m), (0, 0)))


def _cparams(semantics):
    return pltpu.CompilerParams(
        dimension_semantics=semantics,
        vmem_limit_bytes=VMEM_LIMIT_BYTES,
    )


# ----------------------------- Pallas kernels -----------------------------

def _matmul_kernel(x_ref, w_ref, o_ref):
    y = jnp.dot(x_ref[...], w_ref[...], preferred_element_type=jnp.float32)
    o_ref[...] = y.astype(o_ref.dtype)


def _matmul_bias_kernel(x_ref, w_ref, b_ref, o_ref):
    y = jnp.dot(x_ref[...], w_ref[...], preferred_element_type=jnp.float32)
    y = y + b_ref[...].astype(jnp.float32)
    o_ref[...] = y.astype(o_ref.dtype)


def _layernorm_f32(x, g, b, eps):
    mean = jnp.mean(x, axis=-1, keepdims=True)
    var = jnp.mean(jnp.square(x - mean), axis=-1, keepdims=True)
    return (x - mean) * jax.lax.rsqrt(var + eps) * g + b


def _layernorm_kernel(x_ref, g_ref, b_ref, o_ref, *, eps):
    x = x_ref[...].astype(jnp.float32)
    y = _layernorm_f32(x, g_ref[...], b_ref[...], eps)
    o_ref[...] = y.astype(o_ref.dtype)


def _ln_linear_kernel(x_ref, g_ref, b_ref, w_ref, wb_ref, o_ref, *, eps):
    """LayerNorm (f32) fused into the prologue of a bf16 MXU matmul + f32 bias epilogue."""
    x = x_ref[...].astype(jnp.float32)
    xn = _layernorm_f32(x, g_ref[...], b_ref[...], eps).astype(COMPUTE_DTYPE)
    y = jnp.dot(xn, w_ref[...], preferred_element_type=jnp.float32)
    y = y + wb_ref[...].astype(jnp.float32)
    o_ref[...] = y.astype(o_ref.dtype)


def _ln_mlp_residual_kernel(x_ref, g_ref, b_ref, w1_ref, b1_ref, w2_ref, b2_ref,
                            o_ref, acc_ref, xn_ref, *, eps):
    """LayerNorm + fc1 + quick_gelu + fc2 + residual, hidden dim tiled on grid axis 1.

    acc_ref: f32 (tm, D) accumulator; xn_ref: bf16 (tm, D) cache of LN(x) computed at j==0.
    """
    j = pl.program_id(1)

    @pl.when(j == 0)
    def _():
        x = x_ref[...].astype(jnp.float32)
        xn_ref[...] = _layernorm_f32(x, g_ref[...], b_ref[...], eps).astype(COMPUTE_DTYPE)
        acc_ref[...] = jnp.zeros_like(acc_ref)

    a = jnp.dot(xn_ref[...], w1_ref[...], preferred_element_type=jnp.float32)
    a = a + b1_ref[...].astype(jnp.float32)
    a = a * jax.nn.sigmoid(1.702 * a)                       # CLIP quick_gelu (f32)
    acc_ref[...] += jnp.dot(a.astype(COMPUTE_DTYPE), w2_ref[...],
                            preferred_element_type=jnp.float32)

    @pl.when(j == pl.num_programs(1) - 1)
    def _():
        y = acc_ref[...] + b2_ref[...].astype(jnp.float32) + x_ref[...].astype(jnp.float32)
        o_ref[...] = y.astype(o_ref.dtype)                  # residual = pre-LN input


def _attn_kernel(qkv_ref, wo_ref, bo_ref, resid_ref, o_ref, acc_ref, attn_ref,
                 *, heads_per_step, head_dim, seq_len):
    """One head group of one batch element: softmax attention, out-proj accumulate, residual.

    qkv_ref block is (1, S_pad, 3*hw) with columns [Q_group | K_group | V_group] (hw each),
    the attention scale is pre-folded into the Q weights.  PV results go straight into a
    bf16 VMEM slab (no concat / no f32 head list), out-proj partials accumulate into an f32
    VMEM scratch; the residual + bias are added at the last head group.
    """
    g = pl.program_id(1)
    hw = heads_per_step * head_dim

    @pl.when(g == 0)
    def _():
        acc_ref[...] = jnp.zeros_like(acc_ref)

    qkv = qkv_ref[0]                                        # (S_pad, 3*hw) bf16
    s_pad = qkv.shape[0]

    if s_pad != seq_len:
        key_pos = jax.lax.broadcasted_iota(jnp.int32, (1, s_pad), 1)
        key_mask = jnp.where(key_pos < seq_len, 0.0, -1e30).astype(jnp.float32)
    else:
        key_mask = None

    for h in range(heads_per_step):
        q = qkv[:, h * head_dim:(h + 1) * head_dim]                 # already scaled
        k = qkv[:, hw + h * head_dim:hw + (h + 1) * head_dim]
        v = qkv[:, 2 * hw + h * head_dim:2 * hw + (h + 1) * head_dim]
        s = jax.lax.dot_general(q, k, (((1,), (1,)), ((), ())),
                                preferred_element_type=jnp.float32)
        if key_mask is not None:
            s = s + key_mask                                        # (1, S_pad) broadcast
        m = jnp.max(s, axis=-1, keepdims=True)
        e = jnp.exp(s - m)
        l = jnp.sum(e, axis=-1, keepdims=True)
        p = (e * pl.reciprocal(l, approx=True)).astype(COMPUTE_DTYPE)
        pv = jnp.dot(p, v, preferred_element_type=jnp.float32)
        attn_ref[:, h * head_dim:(h + 1) * head_dim] = pv.astype(COMPUTE_DTYPE)

    acc_ref[...] += jnp.dot(attn_ref[...], wo_ref[...],
                            preferred_element_type=jnp.float32)

    @pl.when(g == pl.num_programs(1) - 1)
    def _():
        y = acc_ref[...] + bo_ref[...].astype(jnp.float32) + resid_ref[0].astype(jnp.float32)
        o_ref[0] = y.astype(o_ref.dtype)


# ----------------------------- pallas_call wrappers -----------------------------

def tiled_linear(x, w, b=None, out_dtype=None):
    """x: (M, K) @ w: (K, N) [+ b]; rows padded up to a tile multiple (never shrink tile)."""
    M, K = x.shape
    N = w.shape[1]
    out_dtype = out_dtype or x.dtype
    tm = _row_tile(M)
    m_pad = _round_up(M, tm)
    xp = _pad_rows(x, m_pad)
    in_specs = [
        pl.BlockSpec((tm, K), lambda i: (i, 0)),
        pl.BlockSpec((K, N), lambda i: (0, 0)),
    ]
    args = [xp, w]
    if b is not None:
        in_specs.append(pl.BlockSpec((1, N), lambda i: (0, 0)))
        args.append(b.reshape(1, N))
        kern = _matmul_bias_kernel
    else:
        kern = _matmul_kernel
    out = pl.pallas_call(
        kern,
        out_shape=jax.ShapeDtypeStruct((m_pad, N), out_dtype),
        grid=(m_pad // tm,),
        in_specs=in_specs,
        out_specs=pl.BlockSpec((tm, N), lambda i: (i, 0)),
        compiler_params=_cparams(("parallel",)),
    )(*args)
    return out if m_pad == M else out[:M]


def layernorm(x, gamma, beta, eps=1e-5, out_dtype=None):
    M, D = x.shape
    tm = _row_tile(M)
    m_pad = _round_up(M, tm)
    xp = _pad_rows(x, m_pad)
    kern = functools.partial(_layernorm_kernel, eps=eps)
    out = pl.pallas_call(
        kern,
        out_shape=jax.ShapeDtypeStruct((m_pad, D), out_dtype or x.dtype),
        grid=(m_pad // tm,),
        in_specs=[
            pl.BlockSpec((tm, D), lambda i: (i, 0)),
            pl.BlockSpec((1, D), lambda i: (0, 0)),
            pl.BlockSpec((1, D), lambda i: (0, 0)),
        ],
        out_specs=pl.BlockSpec((tm, D), lambda i: (i, 0)),
        compiler_params=_cparams(("parallel",)),
    )(xp, gamma.reshape(1, D), beta.reshape(1, D))
    return out if m_pad == M else out[:M]


def ln_linear(x, g, b, w, wb, eps=1e-5, out_dtype=None):
    M, D = x.shape
    N = w.shape[1]
    tm = _row_tile(M)
    m_pad = _round_up(M, tm)
    xp = _pad_rows(x, m_pad)
    kern = functools.partial(_ln_linear_kernel, eps=eps)
    out = pl.pallas_call(
        kern,
        out_shape=jax.ShapeDtypeStruct((m_pad, N), out_dtype or x.dtype),
        grid=(m_pad // tm,),
        in_specs=[
            pl.BlockSpec((tm, D), lambda i: (i, 0)),
            pl.BlockSpec((1, D), lambda i: (0, 0)),
            pl.BlockSpec((1, D), lambda i: (0, 0)),
            pl.BlockSpec((D, N), lambda i: (0, 0)),
            pl.BlockSpec((1, N), lambda i: (0, 0)),
        ],
        out_specs=pl.BlockSpec((tm, N), lambda i: (i, 0)),
        compiler_params=_cparams(("parallel",)),
    )(xp, g.reshape(1, D), b.reshape(1, D), w, wb.reshape(1, N))
    return out if m_pad == M else out[:M]


def ln_mlp_residual(x, g, b, w1, b1, w2, b2, eps=1e-5, out_dtype=None):
    M, D = x.shape
    H = w1.shape[1]
    tm = _row_tile(M)
    m_pad = _round_up(M, tm)
    th = _hidden_tile(H)
    xp = _pad_rows(x, m_pad)
    kern = functools.partial(_ln_mlp_residual_kernel, eps=eps)
    out = pl.pallas_call(
        kern,
        out_shape=jax.ShapeDtypeStruct((m_pad, D), out_dtype or x.dtype),
        grid=(m_pad // tm, H // th),
        in_specs=[
            pl.BlockSpec((tm, D), lambda i, j: (i, 0)),
            pl.BlockSpec((1, D), lambda i, j: (0, 0)),
            pl.BlockSpec((1, D), lambda i, j: (0, 0)),
            pl.BlockSpec((D, th), lambda i, j: (0, j)),
            pl.BlockSpec((1, th), lambda i, j: (0, j)),
            pl.BlockSpec((th, D), lambda i, j: (j, 0)),
            pl.BlockSpec((1, D), lambda i, j: (0, 0)),
        ],
        out_specs=pl.BlockSpec((tm, D), lambda i, j: (i, 0)),
        scratch_shapes=[
            pltpu.VMEM((tm, D), jnp.float32),      # fc2 accumulator
            pltpu.VMEM((tm, D), COMPUTE_DTYPE),    # LN(x) cache
        ],
        compiler_params=_cparams(("parallel", "arbitrary")),
    )(xp, g.reshape(1, D), b.reshape(1, D), w1, b1.reshape(1, H), w2, b2.reshape(1, D))
    return out if m_pad == M else out[:M]


def attention_block(qkv, wo, bo, resid, num_heads, seq_len, out_dtype=None):
    """qkv: (B, S_pad, 3D) head-grouped, resid: (B, S_pad, D) -> resid + out_proj(attn)."""
    B, S_pad, threeD = qkv.shape
    D = threeD // 3
    head_dim = D // num_heads
    hpg = _heads_per_step(num_heads, head_dim)
    G = num_heads // hpg
    hw = hpg * head_dim
    kern = functools.partial(_attn_kernel, heads_per_step=hpg, head_dim=head_dim,
                             seq_len=seq_len)
    return pl.pallas_call(
        kern,
        out_shape=jax.ShapeDtypeStruct((B, S_pad, D), out_dtype or resid.dtype),
        grid=(B, G),
        in_specs=[
            pl.BlockSpec((1, S_pad, 3 * hw), lambda b, g: (b, 0, g)),
            pl.BlockSpec((hw, D), lambda b, g: (g, 0)),
            pl.BlockSpec((1, D), lambda b, g: (0, 0)),
            pl.BlockSpec((1, S_pad, D), lambda b, g: (b, 0, 0)),
        ],
        out_specs=pl.BlockSpec((1, S_pad, D), lambda b, g: (b, 0, 0)),
        scratch_shapes=[
            pltpu.VMEM((S_pad, D), jnp.float32),       # out-proj + residual accumulator
            pltpu.VMEM((S_pad, hw), COMPUTE_DTYPE),    # per-group PV slab (bf16)
        ],
        compiler_params=_cparams(("parallel", "arbitrary")),
    )(qkv, wo, bo.reshape(1, D), resid)


# ----------------------------- Model forward -----------------------------

def image_prefix_captioner_forward(pixel_values, params, cfg):
    """Mirrors ImagePrefixCaptioner.forward with generate_kwargs=None -> (B, 1, proj_dim)."""
    B, C, H, W = pixel_values.shape
    p = cfg["patch"]
    D = cfg["hidden"]
    NH = cfg["heads"]
    nph, npw = H // p, W // p
    NP = nph * npw
    S = NP + 1
    S_pad = _round_up(S, 8)
    eps = 1e-5
    dt = COMPUTE_DTYPE

    # --- CLIP vision embeddings: Conv2d(k=p, s=p, bias=False) as a patch matmul ---
    x = pixel_values.reshape(B, C, nph, p, npw, p)
    x = jnp.transpose(x, (0, 2, 4, 1, 3, 5)).reshape(B * NP, C * p * p)
    kp = C * p * p
    kp_pad = _round_up(kp, 128)
    if kp_pad != kp:
        x = jnp.pad(x, ((0, 0), (0, kp_pad - kp)))
    patch_embeds = tiled_linear(x.astype(dt), params["patch_w"],
                                out_dtype=jnp.float32).reshape(B, NP, D)

    cls = jnp.broadcast_to(params["class_embed"].reshape(1, 1, D), (B, 1, D))
    h = jnp.concatenate([cls, patch_embeds], axis=1) + params["pos_embed"][None]  # f32
    if S_pad != S:
        h = jnp.pad(h, ((0, 0), (0, S_pad - S), (0, 0)))
    M = B * S_pad

    # --- pre layernorm (HF CLIP pre_layrnorm); residual stream stays f32 between kernels ---
    h = layernorm(h.reshape(M, D), params["pre_ln_g"], params["pre_ln_b"],
                  eps=eps, out_dtype=jnp.float32).reshape(B, S_pad, D)

    # --- encoder layers: 3 fused pallas_calls per layer ---
    for layer in params["layers"]:
        h2d = h.reshape(M, D)
        qkv = ln_linear(h2d, layer["ln1_g"], layer["ln1_b"],
                        layer["wqkv"], layer["bqkv"], eps=eps,
                        out_dtype=dt).reshape(B, S_pad, 3 * D)
        h = attention_block(qkv, layer["wo"], layer["bo"], h, NH, S,
                            out_dtype=jnp.float32)
        h = ln_mlp_residual(h.reshape(M, D), layer["ln2_g"], layer["ln2_b"],
                            layer["w1"], layer["b1"], layer["w2"], layer["b2"],
                            eps=eps, out_dtype=jnp.float32).reshape(B, S_pad, D)

    # HF CLIP last_hidden_state has no post_layernorm; module slices [:, 0, :] (CLS).
    cls_feat = h[:, 0, :].astype(dt)                                        # (B, D)
    image_embeds = tiled_linear(cls_feat, params["proj_w"], params["proj_b"],
                                out_dtype=jnp.float32)                      # (B, proj_dim)
    prefix_embed = image_embeds[:, None, :]                                 # unsqueeze(1)
    # TODO(synk): language_model.generate(inputs_embeds=prefix_embed) autoregressive decoding not implemented.
    return prefix_embed


# ----------------------------- Params -----------------------------

def _pack_qkv_grouped(wq, wk, wv, bq, bk, bv, num_heads, heads_per_step, scale):
    """Head-grouped fused QKV layout [Q_g0|K_g0|V_g0|Q_g1|K_g1|V_g1|...] with the attention
    scale folded into the Q columns/bias (zero runtime cost)."""
    D = wq.shape[0]
    hd = D // num_heads
    hw = hd * heads_per_step
    wq = wq * scale
    bq = bq * scale
    w_cols, b_cols = [], []
    for g in range(num_heads // heads_per_step):
        sl = slice(g * hw, (g + 1) * hw)
        w_cols += [wq[:, sl], wk[:, sl], wv[:, sl]]
        b_cols += [bq[sl], bk[sl], bv[sl]]
    return jnp.concatenate(w_cols, axis=1), jnp.concatenate(b_cols, axis=0)


def init_params(key, cfg, S):
    C, p = cfg["C"], cfg["patch"]
    D, MLP, L, PD = cfg["hidden"], cfg["mlp"], cfg["layers"], cfg["proj_dim"]
    NH = cfg["heads"]
    hd = D // NH
    hpg = _heads_per_step(NH, hd)
    scale = hd ** -0.5
    kp = C * p * p
    kp_pad = _round_up(kp, 128)
    keys = iter(jax.random.split(key, 8 + 12 * L))
    wdt = COMPUTE_DTYPE

    def nrm(shape, s=0.02):
        return s * jax.random.normal(next(keys), shape, dtype=jnp.float32)

    params = {
        # conv bias=False in CLIP -> no patch bias; K zero-padded to a multiple of 128
        "patch_w": jnp.pad(nrm((kp, D)), ((0, kp_pad - kp), (0, 0))).astype(wdt),
        "class_embed": nrm((D,)),
        "pos_embed": nrm((S, D)),
        "pre_ln_g": jnp.ones((D,), jnp.float32),
        "pre_ln_b": jnp.zeros((D,), jnp.float32),
        "layers": [],
        "proj_w": nrm((D, PD)).astype(wdt),
        "proj_b": nrm((PD,)),
    }
    for _ in range(L):
        wq, wk, wv = nrm((D, D)), nrm((D, D)), nrm((D, D))
        bq, bk, bv = nrm((D,)), nrm((D,)), nrm((D,))
        wqkv, bqkv = _pack_qkv_grouped(wq, wk, wv, bq, bk, bv, NH, hpg, scale)
        params["layers"].append({
            "ln1_g": jnp.ones((D,), jnp.float32), "ln1_b": jnp.zeros((D,), jnp.float32),
            "wqkv": wqkv.astype(wdt), "bqkv": bqkv,
            "wo": nrm((D, D)).astype(wdt), "bo": nrm((D,)),
            "ln2_g": jnp.ones((D,), jnp.float32), "ln2_b": jnp.zeros((D,), jnp.float32),
            "w1": nrm((D, MLP)).astype(wdt), "b1": nrm((MLP,)),
            "w2": nrm((MLP, D)).astype(wdt), "b2": nrm((D,)),
        })
    return params


# ----------------------------- Main -----------------------------

if __name__ == "__main__":
    cfg = dict(C=3, patch=8, hidden=32, heads=4, mlp=64, layers=2, proj_dim=24, img=16)
    B = 2
    NP = (cfg["img"] // cfg["patch"]) ** 2
    S = NP + 1

    key = jax.random.PRNGKey(0)
    pkey, xkey = jax.random.split(key)
    params = init_params(pkey, cfg, S)
    pixel_values = jax.random.normal(
        xkey, (B, cfg["C"], cfg["img"], cfg["img"]), dtype=jnp.float32)

    @jax.jit
    def run(pv, prm):
        return image_prefix_captioner_forward(pv, prm, cfg)

    out = run(pixel_values, params)
    jax.block_until_ready(out)
    assert out.shape == (B, 1, cfg["proj_dim"]), out.shape
    assert out.dtype == jnp.float32, out.dtype
    assert bool(jnp.all(jnp.isfinite(out)))
    print("KERNEL_OK")
</pallas_src>

<mosaic_0001>
module attributes {stable_mosaic.version = 11 : i64} {
  func.func @_matmul_kernel(%arg0: i32, %arg1: memref<8x256xbf16, #tpu.memory_space<vmem>>, %arg2: memref<256x32xbf16, #tpu.memory_space<vmem>>, %arg3: memref<8x32xf32, #tpu.memory_space<vmem>>) attributes {dimension_semantics = [#tpu.dimension_semantics<parallel>], iteration_bounds = array<i64: 1>, scalar_prefetch = 0 : i64, scratch_operands = 0 : i64, tpu.core_type = #tpu.core_type<tc>, window_params = [{transform_indices = @transform_0, window_bounds = array<i64: 8, 256>}, {pipeline_mode = #tpu.pipeline_mode<synchronous>, transform_indices = @transform_1, window_bounds = array<i64: 256, 32>}, {transform_indices = @transform_2, window_bounds = array<i64: 8, 32>}]} {
    %c0 = arith.constant 0 : index
    %c0_0 = arith.constant 0 : index
    %0 = vector.load %arg1[%c0, %c0_0] : memref<8x256xbf16, #tpu.memory_space<vmem>>, vector<8x256xbf16>
    %c0_1 = arith.constant 0 : index
    %c0_2 = arith.constant 0 : index
    %1 = vector.load %arg2[%c0_1, %c0_2] : memref<256x32xbf16, #tpu.memory_space<vmem>>, vector<256x32xbf16>
    %cst = arith.constant dense<0.000000e+00> : vector<8x32xf32>
    %2 = tpu.matmul %0, %1, %cst {dimension_numbers = #tpu.dot_dimension_numbers<[1], [0], [0], [1], [0, 0, 1, 1], [], []>} : vector<8x256xbf16>, vector<256x32xbf16>, vector<8x32xf32> -> vector<8x32xf32>
    %c0_3 = arith.constant 0 : index
    %c0_4 = arith.constant 0 : index
    %3 = vector.load %arg3[%c0_3, %c0_4] : memref<8x32xf32, #tpu.memory_space<vmem>>, vector<8x32xf32>
    tpu.vector_store %arg3[%c0_3, %c0_4], %2 {strides = array<i32>} : memref<8x32xf32, #tpu.memory_space<vmem>>, vector<8x32xf32>,
    return
  }
  func.func @transform_0(%arg0: i32) -> (i32, i32) {
    %c0_i32 = arith.constant 0 : i32
    %c0_i32_0 = arith.constant 0 : i32
    return %arg0, %c0_i32 : i32, i32
  }
  func.func @transform_1(%arg0: i32) -> (i32, i32) {
    %c0_i32 = arith.constant 0 : i32
    %c0_i32_0 = arith.constant 0 : i32
    %c0_i32_1 = arith.constant 0 : i32
    return %c0_i32, %c0_i32_0 : i32, i32
  }
  func.func @transform_2(%arg0: i32) -> (i32, i32) {
    %c0_i32 = arith.constant 0 : i32
    %c0_i32_0 = arith.constant 0 : i32
    return %arg0, %c0_i32 : i32, i32
  }
}

module attributes {stable_mosaic.version = 11 : i64} {
  func.func @_layernorm_kernel(%arg0: i32, %arg1: memref<16x32xf32, #tpu.memory_space<vmem>>, %arg2: memref<1x32xf32, #tpu.memory_space<vmem>>, %arg3: memref<1x32xf32, #tpu.memory_space<vmem>>, %arg4: memref<16x32xf32, #tpu.memory_space<vmem>>) attributes {dimension_semantics = [#tpu.dimension_semantics<parallel>], iteration_bounds = array<i64: 1>, scalar_prefetch = 0 : i64, scratch_operands = 0 : i64, tpu.core_type = #tpu.core_type<tc>, window_params = [{transform_indices = @transform_0, window_bounds = array<i64: 16, 32>}, {pipeline_mode = #tpu.pipeline_mode<synchronous>, transform_indices = @transform_1, window_bounds = array<i64: 1, 32>}, {pipeline_mode = #tpu.pipeline_mode<synchronous>, transform_indices = @transform_2, window_bounds = array<i64: 1, 32>}, {transform_indices = @transform_3, window_bounds = array<i64: 16, 32>}]} {
    %c0 = arith.constant 0 : index
    %c0_0 = arith.constant 0 : index
    %0 = vector.load %arg1[%c0, %c0_0] : memref<16x32xf32, #tpu.memory_space<vmem>>, vector<16x32xf32>
    %c0_1 = arith.constant 0 : index
    %c0_2 = arith.constant 0 : index
    %1 = vector.load %arg2[%c0_1, %c0_2] : memref<1x32xf32, #tpu.memory_space<vmem>>, vector<1x32xf32>
    %c0_3 = arith.constant 0 : index
    %c0_4 = arith.constant 0 : index
    %2 = vector.load %arg3[%c0_3, %c0_4] : memref<1x32xf32, #tpu.memory_space<vmem>>, vector<1x32xf32>
    %cst = arith.constant dense<0.000000e+00> : vector<16xf32>
    %3 = vector.multi_reduction <add>, %0, %cst [1] : vector<16x32xf32> to vector<16xf32>
    %4 = vector.shape_cast %3 : vector<16xf32> to vector<16x1xf32>
    %cst_5 = arith.constant 3.200000e+01 : f32
    %5 = vector.broadcast %cst_5 : f32 to vector<16x1xf32>
    %6 = arith.divf %4, %5 : vector<16x1xf32>
    %7 = vector.broadcast %6 : vector<16x1xf32> to vector<16x32xf32>
    %8 = arith.subf %0, %7 : vector<16x32xf32>
    %9 = arith.mulf %8, %8 : vector<16x32xf32>
    %cst_6 = arith.constant dense<0.000000e+00> : vector<16xf32>
    %10 = vector.multi_reduction <add>, %9, %cst_6 [1] : vector<16x32xf32> to vector<16xf32>
    %11 = vector.shape_cast %10 : vector<16xf32> to vector<16x1xf32>
    %cst_7 = arith.constant 3.200000e+01 : f32
    %12 = vector.broadcast %cst_7 : f32 to vector<16x1xf32>
    %13 = arith.divf %11, %12 : vector<16x1xf32>
    %14 = vector.broadcast %6 : vector<16x1xf32> to vector<16x32xf32>
    %15 = arith.subf %0, %14 : vector<16x32xf32>
    %cst_8 = arith.constant 9.99999974E-6 : f32
    %16 = vector.broadcast %cst_8 : f32 to vector<16x1xf32>
    %17 = arith.addf %13, %16 : vector<16x1xf32>
    %18 = math.rsqrt %17 : vector<16x1xf32>
    %19 = vector.broadcast %18 : vector<16x1xf32> to vector<16x32xf32>
    %20 = arith.mulf %15, %19 : vector<16x32xf32>
    %21 = vector.broadcast %1 : vector<1x32xf32> to vector<16x32xf32>
    %22 = arith.mulf %20, %21 : vector<16x32xf32>
    %23 = vector.broadcast %2 : vector<1x32xf32> to vector<16x32xf32>
    %24 = arith.addf %22, %23 : vector<16x32xf32>
    %c0_9 = arith.constant 0 : index
    %c0_10 = arith.constant 0 : index
    %25 = vector.load %arg4[%c0_9, %c0_10] : memref<16x32xf32, #tpu.memory_space<vmem>>, vector<16x32xf32>
    tpu.vector_store %arg4[%c0_9, %c0_10], %24 {strides = array<i32>} : memref<16x32xf32, #tpu.memory_space<vmem>>, vector<16x32xf32>,
    return
  }
  func.func @transform_0(%arg0: i32) -> (i32, i32) {
    %c0_i32 = arith.constant 0 : i32
    %c0_i32_0 = arith.constant 0 : i32
    return %arg0, %c0_i32 : i32, i32
  }
  func.func @transform_1(%arg0: i32) -> (i32, i32) {
    %c0_i32 = arith.constant 0 : i32
    %c0_i32_0 = arith.constant 0 : i32
    %c0_i32_1 = arith.constant 0 : i32
    return %c0_i32, %c0_i32_0 : i32, i32
  }
  func.func @transform_2(%arg0: i32) -> (i32, i32) {
    %c0_i32 = arith.constant 0 : i32
    %c0_i32_0 = arith.constant 0 : i32
    %c0_i32_1 = arith.constant 0 : i32
    return %c0_i32, %c0_i32_0 : i32, i32
  }
  func.func @transform_3(%arg0: i32) -> (i32, i32) {
    %c0_i32 = arith.constant 0 : i32
    %c0_i32_0 = arith.constant 0 : i32
    return %arg0, %c0_i32 : i32, i32
  }
}

module attributes {stable_mosaic.version = 11 : i64} {
  func.func @_ln_linear_kernel(%arg0: i32, %arg1: memref<16x32xf32, #tpu.memory_space<vmem>>, %arg2: memref<1x32xf32, #tpu.memory_space<vmem>>, %arg3: memref<1x32xf32, #tpu.memory_space<vmem>>, %arg4: memref<32x96xbf16, #tpu.memory_space<vmem>>, %arg5: memref<1x96xf32, #tpu.memory_space<vmem>>, %arg6: memref<16x96xbf16, #tpu.memory_space<vmem>>) attributes {dimension_semantics = [#tpu.dimension_semantics<parallel>], iteration_bounds = array<i64: 1>, scalar_prefetch = 0 : i64, scratch_operands = 0 : i64, tpu.core_type = #tpu.core_type<tc>, window_params = [{transform_indices = @transform_0, window_bounds = array<i64: 16, 32>}, {pipeline_mode = #tpu.pipeline_mode<synchronous>, transform_indices = @transform_1, window_bounds = array<i64: 1, 32>}, {pipeline_mode = #tpu.pipeline_mode<synchronous>, transform_indices = @transform_2, window_bounds = array<i64: 1, 32>}, {pipeline_mode = #tpu.pipeline_mode<synchronous>, transform_indices = @transform_3, window_bounds = array<i64: 32, 96>}, {pipeline_mode = #tpu.pipeline_mode<synchronous>, transform_indices = @transform_4, window_bounds = array<i64: 1, 96>}, {transform_indices = @transform_5, window_bounds = array<i64: 16, 96>}]} {
    %c0 = arith.constant 0 : index
    %c0_0 = arith.constant 0 : index
    %0 = vector.load %arg1[%c0, %c0_0] : memref<16x32xf32, #tpu.memory_space<vmem>>, vector<16x32xf32>
    %c0_1 = arith.constant 0 : index
    %c0_2 = arith.constant 0 : index
    %1 = vector.load %arg2[%c0_1, %c0_2] : memref<1x32xf32, #tpu.memory_space<vmem>>, vector<1x32xf32>
    %c0_3 = arith.constant 0 : index
    %c0_4 = arith.constant 0 : index
    %2 = vector.load %arg3[%c0_3, %c0_4] : memref<1x32xf32, #tpu.memory_space<vmem>>, vector<1x32xf32>
    %cst = arith.constant dense<0.000000e+00> : vector<16xf32>
    %3 = vector.multi_reduction <add>, %0, %cst [1] : vector<16x32xf32> to vector<16xf32>
    %4 = vector.shape_cast %3 : vector<16xf32> to vector<16x1xf32>
    %cst_5 = arith.constant 3.200000e+01 : f32
    %5 = vector.broadcast %cst_5 : f32 to vector<16x1xf32>
    %6 = arith.divf %4, %5 : vector<16x1xf32>
    %7 = vector.broadcast %6 : vector<16x1xf32> to vector<16x32xf32>
    %8 = arith.subf %0, %7 : vector<16x32xf32>
    %9 = arith.mulf %8, %8 : vector<16x32xf32>
    %cst_6 = arith.constant dense<0.000000e+00> : vector<16xf32>
    %10 = vector.multi_reduction <add>, %9, %cst_6 [1] : vector<16x32xf32> to vector<16xf32>
    %11 = vector.shape_cast %10 : vector<16xf32> to vector<16x1xf32>
    %cst_7 = arith.constant 3.200000e+01 : f32
    %12 = vector.broadcast %cst_7 : f32 to vector<16x1xf32>
    %13 = arith.divf %11, %12 : vector<16x1xf32>
    %14 = vector.broadcast %6 : vector<16x1xf32> to vector<16x32xf32>
    %15 = arith.subf %0, %14 : vector<16x32xf32>
    %cst_8 = arith.constant 9.99999974E-6 : f32
    %16 = vector.broadcast %cst_8 : f32 to vector<16x1xf32>
    %17 = arith.addf %13, %16 : vector<16x1xf32>
    %18 = math.rsqrt %17 : vector<16x1xf32>
    %19 = vector.broadcast %18 : vector<16x1xf32> to vector<16x32xf32>
    %20 = arith.mulf %15, %19 : vector<16x32xf32>
    %21 = vector.broadcast %1 : vector<1x32xf32> to vector<16x32xf32>
    %22 = arith.mulf %20, %21 : vector<16x32xf32>
    %23 = vector.broadcast %2 : vector<1x32xf32> to vector<16x32xf32>
    %24 = arith.addf %22, %23 : vector<16x32xf32>
    %25 = arith.truncf %24 : vector<16x32xf32> to vector<16x32xbf16>
    %c0_9 = arith.constant 0 : index
    %c0_10 = arith.constant 0 : index
    %26 = vector.load %arg4[%c0_9, %c0_10] : memref<32x96xbf16, #tpu.memory_space<vmem>>, vector<32x96xbf16>
    %cst_11 = arith.constant dense<0.000000e+00> : vector<16x96xf32>
    %27 = tpu.matmul %25, %26, %cst_11 {dimension_numbers = #tpu.dot_dimension_numbers<[1], [0], [0], [1], [0, 0, 1, 1], [], []>} : vector<16x32xbf16>, vector<32x96xbf16>, vector<16x96xf32> -> vector<16x96xf32>
    %c0_12 = arith.constant 0 : index
    %c0_13 = arith.constant 0 : index
    %28 = vector.load %arg5[%c0_12, %c0_13] : memref<1x96xf32, #tpu.memory_space<vmem>>, vector<1x96xf32>
    %29 = vector.broadcast %28 : vector<1x96xf32> to vector<16x96xf32>
    %30 = arith.addf %27, %29 : vector<16x96xf32>
    %31 = arith.truncf %30 : vector<16x96xf32> to vector<16x96xbf16>
    %c0_14 = arith.constant 0 : index
    %c0_15 = arith.constant 0 : index
    %32 = vector.load %arg6[%c0_14, %c0_15] : memref<16x96xbf16, #tpu.memory_space<vmem>>, vector<16x96xbf16>
    tpu.vector_store %arg6[%c0_14, %c0_15], %31 {strides = array<i32>} : memref<16x96xbf16, #tpu.memory_space<vmem>>, vector<16x96xbf16>,
    return
  }
  func.func @transform_0(%arg0: i32) -> (i32, i32) {
    %c0_i32 = arith.constant 0 : i32
    %c0_i32_0 = arith.constant 0 : i32
    return %arg0, %c0_i32 : i32, i32
  }
  func.func @transform_1(%arg0: i32) -> (i32, i32) {
    %c0_i32 = arith.constant 0 : i32
    %c0_i32_0 = arith.constant 0 : i32
    %c0_i32_1 = arith.constant 0 : i32
    return %c0_i32, %c0_i32_0 : i32, i32
  }
  func.func @transform_2(%arg0: i32) -> (i32, i32) {
    %c0_i32 = arith.constant 0 : i32
    %c0_i32_0 = arith.constant 0 : i32
    %c0_i32_1 = arith.constant 0 : i32
    return %c0_i32, %c0_i32_0 : i32, i32
  }
  func.func @transform_3(%arg0: i32) -> (i32, i32) {
    %c0_i32 = arith.constant 0 : i32
    %c0_i32_0 = arith.constant 0 : i32
    %c0_i32_1 = arith.constant 0 : i32
    return %c0_i32, %c0_i32_0 : i32, i32
  }
  func.func @transform_4(%arg0: i32) -> (i32, i32) {
    %c0_i32 = arith.constant 0 : i32
    %c0_i32_0 = arith.constant 0 : i32
    %c0_i32_1 = arith.constant 0 : i32
    return %c0_i32, %c0_i32_0 : i32, i32
  }
  func.func @transform_5(%arg0: i32) -> (i32, i32) {
    %c0_i32 = arith.constant 0 : i32
    %c0_i32_0 = arith.constant 0 : i32
    return %arg0, %c0_i32 : i32, i32
  }
}

module attributes {stable_mosaic.version = 11 : i64} {
  func.func @_attn_kernel(%arg0: i32, %arg1: i32, %arg2: memref<1x8x96xbf16, #tpu.memory_space<vmem>>, %arg3: memref<32x32xbf16, #tpu.memory_space<vmem>>, %arg4: memref<1x32xf32, #tpu.memory_space<vmem>>, %arg5: memref<1x8x32xf32, #tpu.memory_space<vmem>>, %arg6: memref<1x8x32xf32, #tpu.memory_space<vmem>>, %arg7: memref<8x32xf32, #tpu.memory_space<vmem>>, %arg8: memref<8x32xbf16, #tpu.memory_space<vmem>>) attributes {dimension_semantics = [#tpu.dimension_semantics<parallel>, #tpu.dimension_semantics<arbitrary>], iteration_bounds = array<i64: 2, 1>, scalar_prefetch = 0 : i64, scratch_operands = 2 : i64, tpu.core_type = #tpu.core_type<tc>, window_params = [{transform_indices = @transform_0, window_bounds = array<i64: 1, 8, 96>}, {transform_indices = @transform_1, window_bounds = array<i64: 32, 32>}, {pipeline_mode = #tpu.pipeline_mode<synchronous>, transform_indices = @transform_2, window_bounds = array<i64: 1, 32>}, {transform_indices = @transform_3, window_bounds = array<i64: 1, 8, 32>}, {transform_indices = @transform_4, window_bounds = array<i64: 1, 8, 32>}]} {
    %c0_i32 = arith.constant 0 : i32
    %0 = arith.cmpi eq, %arg1, %c0_i32 : i32
    %1 = arith.extui %0 : i1 to i32
    %c0_i32_0 = arith.constant 0 : i32
    %2 = arith.cmpi ne, %1, %c0_i32_0 : i32
    scf.if %2 {
      %cst_36 = arith.constant 0.000000e+00 : f32
      %100 = vector.broadcast %cst_36 : f32 to vector<8x32xf32>
      %c0_37 = arith.constant 0 : index
      %c0_38 = arith.constant 0 : index
      %101 = vector.load %arg7[%c0_37, %c0_38] : memref<8x32xf32, #tpu.memory_space<vmem>>, vector<8x32xf32>
      tpu.vector_store %arg7[%c0_37, %c0_38], %100 {strides = array<i32>} : memref<8x32xf32, #tpu.memory_space<vmem>>, vector<8x32xf32>,
    } else {
    }
    %c0 = arith.constant 0 : index
    %c0_1 = arith.constant 0 : index
    %c0_2 = arith.constant 0 : index
    %3 = vector.load %arg2[%c0, %c0_1, %c0_2] : memref<1x8x96xbf16, #tpu.memory_space<vmem>>, vector<1x8x96xbf16>
    %4 = vector.shape_cast %3 : vector<1x8x96xbf16> to vector<8x96xbf16>
    %5 = tpu.iota {dimensions = array<i32: 1>} : vector<1x8xi32>
    %c5_i32 = arith.constant 5 : i32
    %6 = vector.broadcast %c5_i32 : i32 to vector<1x8xi32>
    %7 = arith.cmpi slt, %5, %6 : vector<1x8xi32>
    %cst = arith.constant 0.000000e+00 : f32
    %cst_3 = arith.constant -1.000000e+30 : f32
    %8 = vector.broadcast %cst : f32 to vector<1x8xf32>
    %9 = vector.broadcast %cst_3 : f32 to vector<1x8xf32>
    %10 = arith.select %7, %8, %9 : vector<1x8xi1>, vector<1x8xf32>
    %11 = vector.extract_strided_slice %4 {offsets = [0, 0], sizes = [8, 8], strides = [1, 1]} : vector<8x96xbf16> to vector<8x8xbf16>
    %12 = vector.extract_strided_slice %4 {offsets = [0, 32], sizes = [8, 8], strides = [1, 1]} : vector<8x96xbf16> to vector<8x8xbf16>
    %13 = vector.extract_strided_slice %4 {offsets = [0, 64], sizes = [8, 8], strides = [1, 1]} : vector<8x96xbf16> to vector<8x8xbf16>
    %cst_4 = arith.constant dense<0.000000e+00> : vector<8x8xf32>
    %14 = tpu.matmul %11, %12, %cst_4 {dimension_numbers = #tpu.dot_dimension_numbers<[1], [1], [0], [0], [0, 0, 1, 0], [], []>} : vector<8x8xbf16>, vector<8x8xbf16>, vector<8x8xf32> -> vector<8x8xf32>
    %15 = vector.broadcast %10 : vector<1x8xf32> to vector<8x8xf32>
    %16 = arith.addf %14, %15 : vector<8x8xf32>
    %cst_5 = arith.constant dense<0xFF800000> : vector<8xf32>
    %17 = vector.multi_reduction <maximumf>, %16, %cst_5 [1] : vector<8x8xf32> to vector<8xf32>
    %18 = vector.shape_cast %17 : vector<8xf32> to vector<8x1xf32>
    %19 = vector.broadcast %18 : vector<8x1xf32> to vector<8x8xf32>
    %20 = arith.subf %16, %19 : vector<8x8xf32>
    %21 = math.exp %20 : vector<8x8xf32>
    %cst_6 = arith.constant dense<0.000000e+00> : vector<8xf32>
    %22 = vector.multi_reduction <add>, %21, %cst_6 [1] : vector<8x8xf32> to vector<8xf32>
    %23 = vector.shape_cast %22 : vector<8xf32> to vector<8x1xf32>
    %24 = tpu.reciprocal %23 {approx = true} : vector<8x1xf32> -> vector<8x1xf32>
    %25 = vector.broadcast %24 : vector<8x1xf32> to vector<8x8xf32>
    %26 = arith.mulf %21, %25 : vector<8x8xf32>
    %27 = arith.truncf %26 : vector<8x8xf32> to vector<8x8xbf16>
    %cst_7 = arith.constant dense<0.000000e+00> : vector<8x8xf32>
    %28 = tpu.matmul %27, %13, %cst_7 {dimension_numbers = #tpu.dot_dimension_numbers<[1], [0], [0], [1], [0, 0, 1, 1], [], []>} : vector<8x8xbf16>, vector<8x8xbf16>, vector<8x8xf32> -> vector<8x8xf32>
    %29 = arith.truncf %28 : vector<8x8xf32> to vector<8x8xbf16>
    %c0_8 = arith.constant 0 : index
    %c0_9 = arith.constant 0 : index
    %30 = vector.load %arg8[%c0_8, %c0_9] : memref<8x32xbf16, #tpu.memory_space<vmem>>, vector<8x8xbf16>
    tpu.vector_store %arg8[%c0_8, %c0_9], %29 {strides = array<i32>} : memref<8x32xbf16, #tpu.memory_space<vmem>>, vector<8x8xbf16>,
    %31 = vector.extract_strided_slice %4 {offsets = [0, 8], sizes = [8, 8], strides = [1, 1]} : vector<8x96xbf16> to vector<8x8xbf16>
    %32 = vector.extract_strided_slice %4 {offsets = [0, 40], sizes = [8, 8], strides = [1, 1]} : vector<8x96xbf16> to vector<8x8xbf16>
    %33 = vector.extract_strided_slice %4 {offsets = [0, 72], sizes = [8, 8], strides = [1, 1]} : vector<8x96xbf16> to vector<8x8xbf16>
    %cst_10 = arith.constant dense<0.000000e+00> : vector<8x8xf32>
    %34 = tpu.matmul %31, %32, %cst_10 {dimension_numbers = #tpu.dot_dimension_numbers<[1], [1], [0], [0], [0, 0, 1, 0], [], []>} : vector<8x8xbf16>, vector<8x8xbf16>, vector<8x8xf32> -> vector<8x8xf32>
    %35 = vector.broadcast %10 : vector<1x8xf32> to vector<8x8xf32>
    %36 = arith.addf %34, %35 : vector<8x8xf32>
    %cst_11 = arith.constant dense<0xFF800000> : vector<8xf32>
    %37 = vector.multi_reduction <maximumf>, %36, %cst_11 [1] : vector<8x8xf32> to vector<8xf32>
    %38 = vector.shape_cast %37 : vector<8xf32> to vector<8x1xf32>
    %39 = vector.broadcast %38 : vector<8x1xf32> to vector<8x8xf32>
    %40 = arith.subf %36, %39 : vector<8x8xf32>
    %41 = math.exp %40 : vector<8x8xf32>
    %cst_12 = arith.constant dense<0.000000e+00> : vector<8xf32>
    %42 = vector.multi_reduction <add>, %41, %cst_12 [1] : vector<8x8xf32> to vector<8xf32>
    %43 = vector.shape_cast %42 : vector<8xf32> to vector<8x1xf32>
    %44 = tpu.reciprocal %43 {approx = true} : vector<8x1xf32> -> vector<8x1xf32>
    %45 = vector.broadcast %44 : vector<8x1xf32> to vector<8x8xf32>
    %46 = arith.mulf %41, %45 : vector<8x8xf32>
    %47 = arith.truncf %46 : vector<8x8xf32> to vector<8x8xbf16>
    %cst_13 = arith.constant dense<0.000000e+00> : vector<8x8xf32>
    %48 = tpu.matmul %47, %33, %cst_13 {dimension_numbers = #tpu.dot_dimension_numbers<[1], [0], [0], [1], [0, 0, 1, 1], [], []>} : vector<8x8xbf16>, vector<8x8xbf16>, vector<8x8xf32> -> vector<8x8xf32>
    %49 = arith.truncf %48 : vector<8x8xf32> to vector<8x8xbf16>
    %c0_14 = arith.constant 0 : index
    %c8 = arith.constant 8 : index
    %50 = vector.load %arg8[%c0_14, %c8] : memref<8x32xbf16, #tpu.memory_space<vmem>>, vector<8x8xbf16>
    tpu.vector_store %arg8[%c0_14, %c8], %49 {strides = array<i32>} : memref<8x32xbf16, #tpu.memory_space<vmem>>, vector<8x8xbf16>,
    %51 = vector.extract_strided_slice %4 {offsets = [0, 16], sizes = [8, 8], strides = [1, 1]} : vector<8x96xbf16> to vector<8x8xbf16>
    %52 = vector.extract_strided_slice %4 {offsets = [0, 48], sizes = [8, 8], strides = [1, 1]} : vector<8x96xbf16> to vector<8x8xbf16>
    %53 = vector.extract_strided_slice %4 {offsets = [0, 80], sizes = [8, 8], strides = [1, 1]} : vector<8x96xbf16> to vector<8x8xbf16>
    %cst_15 = arith.constant dense<0.000000e+00> : vector<8x8xf32>
    %54 = tpu.matmul %51, %52, %cst_15 {dimension_numbers = #tpu.dot_dimension_numbers<[1], [1], [0], [0], [0, 0, 1, 0], [], []>} : vector<8x8xbf16>, vector<8x8xbf16>, vector<8x8xf32> -> vector<8x8xf32>
    %55 = vector.broadcast %10 : vector<1x8xf32> to vector<8x8xf32>
    %56 = arith.addf %54, %55 : vector<8x8xf32>
    %cst_16 = arith.constant dense<0xFF800000> : vector<8xf32>
    %57 = vector.multi_reduction <maximumf>, %56, %cst_16 [1] : vector<8x8xf32> to vector<8xf32>
    %58 = vector.shape_cast %57 : vector<8xf32> to vector<8x1xf32>
    %59 = vector.broadcast %58 : vector<8x1xf32> to vector<8x8xf32>
    %60 = arith.subf %56, %59 : vector<8x8xf32>
    %61 = math.exp %60 : vector<8x8xf32>
    %cst_17 = arith.constant dense<0.000000e+00> : vector<8xf32>
    %62 = vector.multi_reduction <add>, %61, %cst_17 [1] : vector<8x8xf32> to vector<8xf32>
    %63 = vector.shape_cast %62 : vector<8xf32> to vector<8x1xf32>
    %64 = tpu.reciprocal %63 {approx = true} : vector<8x1xf32> -> vector<8x1xf32>
    %65 = vector.broadcast %64 : vector<8x1xf32> to vector<8x8xf32>
    %66 = arith.mulf %61, %65 : vector<8x8xf32>
    %67 = arith.truncf %66 : vector<8x8xf32> to vector<8x8xbf16>
    %cst_18 = arith.constant dense<0.000000e+00> : vector<8x8xf32>
    %68 = tpu.matmul %67, %53, %cst_18 {dimension_numbers = #tpu.dot_dimension_numbers<[1], [0], [0], [1], [0, 0, 1, 1], [], []>} : vector<8x8xbf16>, vector<8x8xbf16>, vector<8x8xf32> -> vector<8x8xf32>
    %69 = arith.truncf %68 : vector<8x8xf32> to vector<8x8xbf16>
    %c0_19 = arith.constant 0 : index
    %c16 = arith.constant 16 : index
    %70 = vector.load %arg8[%c0_19, %c16] : memref<8x32xbf16, #tpu.memory_space<vmem>>, vector<8x8xbf16>
    tpu.vector_store %arg8[%c0_19, %c16], %69 {strides = array<i32>} : memref<8x32xbf16, #tpu.memory_space<vmem>>, vector<8x8xbf16>,
    %71 = vector.extract_strided_slice %4 {offsets = [0, 24], sizes = [8, 8], strides = [1, 1]} : vector<8x96xbf16> to vector<8x8xbf16>
    %72 = vector.extract_strided_slice %4 {offsets = [0, 56], sizes = [8, 8], strides = [1, 1]} : vector<8x96xbf16> to vector<8x8xbf16>
    %73 = vector.extract_strided_slice %4 {offsets = [0, 88], sizes = [8, 8], strides = [1, 1]} : vector<8x96xbf16> to vector<8x8xbf16>
    %cst_20 = arith.constant dense<0.000000e+00> : vector<8x8xf32>
    %74 = tpu.matmul %71, %72, %cst_20 {dimension_numbers = #tpu.dot_dimension_numbers<[1], [1], [0], [0], [0, 0, 1, 0], [], []>} : vector<8x8xbf16>, vector<8x8xbf16>, vector<8x8xf32> -> vector<8x8xf32>
    %75 = vector.broadcast %10 : vector<1x8xf32> to vector<8x8xf32>
    %76 = arith.addf %74, %75 : vector<8x8xf32>
    %cst_21 = arith.constant dense<0xFF800000> : vector<8xf32>
    %77 = vector.multi_reduction <maximumf>, %76, %cst_21 [1] : vector<8x8xf32> to vector<8xf32>
    %78 = vector.shape_cast %77 : vector<8xf32> to vector<8x1xf32>
    %79 = vector.broadcast %78 : vector<8x1xf32> to vector<8x8xf32>
    %80 = arith.subf %76, %79 : vector<8x8xf32>
    %81 = math.exp %80 : vector<8x8xf32>
    %cst_22 = arith.constant dense<0.000000e+00> : vector<8xf32>
    %82 = vector.multi_reduction <add>, %81, %cst_22 [1] : vector<8x8xf32> to vector<8xf32>
    %83 = vector.shape_cast %82 : vector<8xf32> to vector<8x1xf32>
    %84 = tpu.reciprocal %83 {approx = true} : vector<8x1xf32> -> vector<8x1xf32>
    %85 = vector.broadcast %84 : vector<8x1xf32> to vector<8x8xf32>
    %86 = arith.mulf %81, %85 : vector<8x8xf32>
    %87 = arith.truncf %86 : vector<8x8xf32> to vector<8x8xbf16>
    %cst_23 = arith.constant dense<0.000000e+00> : vector<8x8xf32>
    %88 = tpu.matmul %87, %73, %cst_23 {dimension_numbers = #tpu.dot_dimension_numbers<[1], [0], [0], [1], [0, 0, 1, 1], [], []>} : vector<8x8xbf16>, vector<8x8xbf16>, vector<8x8xf32> -> vector<8x8xf32>
    %89 = arith.truncf %88 : vector<8x8xf32> to vector<8x8xbf16>
    %c0_24 = arith.constant 0 : index
    %c24 = arith.constant 24 : index
    %90 = vector.load %arg8[%c0_24, %c24] : memref<8x32xbf16, #tpu.memory_space<vmem>>, vector<8x8xbf16>
    tpu.vector_store %arg8[%c0_24, %c24], %89 {strides = array<i32>} : memref<8x32xbf16, #tpu.memory_space<vmem>>, vector<8x8xbf16>,
    %c0_25 = arith.constant 0 : index
    %c0_26 = arith.constant 0 : index
    %91 = vector.load %arg7[%c0_25, %c0_26] : memref<8x32xf32, #tpu.memory_space<vmem>>, vector<8x32xf32>
    %c0_27 = arith.constant 0 : index
    %c0_28 = arith.constant 0 : index
    %92 = vector.load %arg8[%c0_27, %c0_28] : memref<8x32xbf16, #tpu.memory_space<vmem>>, vector<8x32xbf16>
    %c0_29 = arith.constant 0 : index
    %c0_30 = arith.constant 0 : index
    %93 = vector.load %arg3[%c0_29, %c0_30] : memref<32x32xbf16, #tpu.memory_space<vmem>>, vector<32x32xbf16>
    %cst_31 = arith.constant dense<0.000000e+00> : vector<8x32xf32>
    %94 = tpu.matmul %92, %93, %cst_31 {dimension_numbers = #tpu.dot_dimension_numbers<[1], [0], [0], [1], [0, 0, 1, 1], [], []>} : vector<8x32xbf16>, vector<32x32xbf16>, vector<8x32xf32> -> vector<8x32xf32>
    %95 = arith.addf %91, %94 : vector<8x32xf32>
    %c0_32 = arith.constant 0 : index
    %c0_33 = arith.constant 0 : index
    %96 = vector.load %arg7[%c0_32, %c0_33] : memref<8x32xf32, #tpu.memory_space<vmem>>, vector<8x32xf32>
    tpu.vector_store %arg7[%c0_32, %c0_33], %95 {strides = array<i32>} : memref<8x32xf32, #tpu.memory_space<vmem>>, vector<8x32xf32>,
    %c0_i32_34 = arith.constant 0 : i32
    %97 = arith.cmpi eq, %arg1, %c0_i32_34 : i32
    %98 = arith.extui %97 : i1 to i32
    %c0_i32_35 = arith.constant 0 : i32
    %99 = arith.cmpi ne, %98, %c0_i32_35 : i32
    scf.if %99 {
      %c0_36 = arith.constant 0 : index
      %c0_37 = arith.constant 0 : index
      %100 = vector.load %arg7[%c0_36, %c0_37] : memref<8x32xf32, #tpu.memory_space<vmem>>, vector<8x32xf32>
      %c0_38 = arith.constant 0 : index
      %c0_39 = arith.constant 0 : index
      %101 = vector.load %arg4[%c0_38, %c0_39] : memref<1x32xf32, #tpu.memory_space<vmem>>, vector<1x32xf32>
      %102 = vector.broadcast %101 : vector<1x32xf32> to vector<8x32xf32>
      %103 = arith.addf %100, %102 : vector<8x32xf32>
      %c0_40 = arith.constant 0 : index
      %c0_41 = arith.constant 0 : index
      %c0_42 = arith.constant 0 : index
      %104 = vector.load %arg5[%c0_40, %c0_41, %c0_42] : memref<1x8x32xf32, #tpu.memory_space<vmem>>, vector<1x8x32xf32>
      %105 = vector.shape_cast %104 : vector<1x8x32xf32> to vector<8x32xf32>
      %106 = arith.addf %103, %105 : vector<8x32xf32>
      %c0_43 = arith.constant 0 : index
      %c0_44 = arith.constant 0 : index
      %c0_45 = arith.constant 0 : index
      %107 = vector.load %arg6[%c0_43, %c0_44, %c0_45] : memref<1x8x32xf32, #tpu.memory_space<vmem>>, vector<1x8x32xf32>
      %108 = vector.shape_cast %107 : vector<1x8x32xf32> to vector<8x32xf32>
      %109 = vector.shape_cast %106 : vector<8x32xf32> to vector<1x8x32xf32>
      tpu.vector_store %arg6[%c0_43, %c0_44, %c0_45], %109 {strides = array<i32>} : memref<1x8x32xf32, #tpu.memory_space<vmem>>, vector<1x8x32xf32>,
    } else {
    }
    return
  }
  func.func @transform_0(%arg0: i32, %arg1: i32) -> (i32, i32, i32) {
    %c0_i32 = arith.constant 0 : i32
    %c0_i32_0 = arith.constant 0 : i32
    return %arg0, %c0_i32, %arg1 : i32, i32, i32
  }
  func.func @transform_1(%arg0: i32, %arg1: i32) -> (i32, i32) {
    %c0_i32 = arith.constant 0 : i32
    %c0_i32_0 = arith.constant 0 : i32
    return %arg1, %c0_i32 : i32, i32
  }
  func.func @transform_2(%arg0: i32, %arg1: i32) -> (i32, i32) {
    %c0_i32 = arith.constant 0 : i32
    %c0_i32_0 = arith.constant 0 : i32
    %c0_i32_1 = arith.constant 0 : i32
    return %c0_i32, %c0_i32_0 : i32, i32
  }
  func.func @transform_3(%arg0: i32, %arg1: i32) -> (i32, i32, i32) {
    %c0_i32 = arith.constant 0 : i32
    %c0_i32_0 = arith.constant 0 : i32
    %c0_i32_1 = arith.constant 0 : i32
    return %arg0, %c0_i32, %c0_i32_0 : i32, i32, i32
  }
  func.func @transform_4(%arg0: i32, %arg1: i32) -> (i32, i32, i32) {
    %c0_i32 = arith.constant 0 : i32
    %c0_i32_0 = arith.constant 0 : i32
    %c0_i32_1 = arith.constant 0 : i32
    return %arg0, %c0_i32, %c0_i32_0 : i32, i32, i32
  }
}

module attributes {stable_mosaic.version = 11 : i64} {
  func.func @_ln_mlp_residual_kernel(%arg0: i32, %arg1: i32, %arg2: memref<16x32xf32, #tpu.memory_space<vmem>>, %arg3: memref<1x32xf32, #tpu.memory_space<vmem>>, %arg4: memref<1x32xf32, #tpu.memory_space<vmem>>, %arg5: memref<32x64xbf16, #tpu.memory_space<vmem>>, %arg6: memref<1x64xf32, #tpu.memory_space<vmem>>, %arg7: memref<64x32xbf16, #tpu.memory_space<vmem>>, %arg8: memref<1x32xf32, #tpu.memory_space<vmem>>, %arg9: memref<16x32xf32, #tpu.memory_space<vmem>>, %arg10: memref<16x32xf32, #tpu.memory_space<vmem>>, %arg11: memref<16x32xbf16, #tpu.memory_space<vmem>>) attributes {dimension_semantics = [#tpu.dimension_semantics<parallel>, #tpu.dimension_semantics<arbitrary>], iteration_bounds = array<i64: 1, 1>, scalar_prefetch = 0 : i64, scratch_operands = 2 : i64, tpu.core_type = #tpu.core_type<tc>, window_params = [{transform_indices = @transform_0, window_bounds = array<i64: 16, 32>}, {pipeline_mode = #tpu.pipeline_mode<synchronous>, transform_indices = @transform_1, window_bounds = array<i64: 1, 32>}, {pipeline_mode = #tpu.pipeline_mode<synchronous>, transform_indices = @transform_2, window_bounds = array<i64: 1, 32>}, {transform_indices = @transform_3, window_bounds = array<i64: 32, 64>}, {transform_indices = @transform_4, window_bounds = array<i64: 1, 64>}, {transform_indices = @transform_5, window_bounds = array<i64: 64, 32>}, {pipeline_mode = #tpu.pipeline_mode<synchronous>, transform_indices = @transform_6, window_bounds = array<i64: 1, 32>}, {transform_indices = @transform_7, window_bounds = array<i64: 16, 32>}]} {
    %c0_i32 = arith.constant 0 : i32
    %0 = arith.cmpi eq, %arg1, %c0_i32 : i32
    %1 = arith.extui %0 : i1 to i32
    %c0_i32_0 = arith.constant 0 : i32
    %2 = arith.cmpi ne, %1, %c0_i32_0 : i32
    scf.if %2 {
      %c0_17 = arith.constant 0 : index
      %c0_18 = arith.constant 0 : index
      %26 = vector.load %arg2[%c0_17, %c0_18] : memref<16x32xf32, #tpu.memory_space<vmem>>, vector<16x32xf32>
      %c0_19 = arith.constant 0 : index
      %c0_20 = arith.constant 0 : index
      %27 = vector.load %arg3[%c0_19, %c0_20] : memref<1x32xf32, #tpu.memory_space<vmem>>, vector<1x32xf32>
      %c0_21 = arith.constant 0 : index
      %c0_22 = arith.constant 0 : index
      %28 = vector.load %arg4[%c0_21, %c0_22] : memref<1x32xf32, #tpu.memory_space<vmem>>, vector<1x32xf32>
      %cst_23 = arith.constant dense<0.000000e+00> : vector<16xf32>
      %29 = vector.multi_reduction <add>, %26, %cst_23 [1] : vector<16x32xf32> to vector<16xf32>
      %30 = vector.shape_cast %29 : vector<16xf32> to vector<16x1xf32>
      %cst_24 = arith.constant 3.200000e+01 : f32
      %31 = vector.broadcast %cst_24 : f32 to vector<16x1xf32>
      %32 = arith.divf %30, %31 : vector<16x1xf32>
      %33 = vector.broadcast %32 : vector<16x1xf32> to vector<16x32xf32>
      %34 = arith.subf %26, %33 : vector<16x32xf32>
      %35 = arith.mulf %34, %34 : vector<16x32xf32>
      %cst_25 = arith.constant dense<0.000000e+00> : vector<16xf32>
      %36 = vector.multi_reduction <add>, %35, %cst_25 [1] : vector<16x32xf32> to vector<16xf32>
      %37 = vector.shape_cast %36 : vector<16xf32> to vector<16x1xf32>
      %cst_26 = arith.constant 3.200000e+01 : f32
      %38 = vector.broadcast %cst_26 : f32 to vector<16x1xf32>
      %39 = arith.divf %37, %38 : vector<16x1xf32>
      %40 = vector.broadcast %32 : vector<16x1xf32> to vector<16x32xf32>
      %41 = arith.subf %26, %40 : vector<16x32xf32>
      %cst_27 = arith.constant 9.99999974E-6 : f32
      %42 = vector.broadcast %cst_27 : f32 to vector<16x1xf32>
      %43 = arith.addf %39, %42 : vector<16x1xf32>
      %44 = math.rsqrt %43 : vector<16x1xf32>
      %45 = vector.broadcast %44 : vector<16x1xf32> to vector<16x32xf32>
      %46 = arith.mulf %41, %45 : vector<16x32xf32>
      %47 = vector.broadcast %27 : vector<1x32xf32> to vector<16x32xf32>
      %48 = arith.mulf %46, %47 : vector<16x32xf32>
      %49 = vector.broadcast %28 : vector<1x32xf32> to vector<16x32xf32>
      %50 = arith.addf %48, %49 : vector<16x32xf32>
      %51 = arith.truncf %50 : vector<16x32xf32> to vector<16x32xbf16>
      %c0_28 = arith.constant 0 : index
      %c0_29 = arith.constant 0 : index
      %52 = vector.load %arg11[%c0_28, %c0_29] : memref<16x32xbf16, #tpu.memory_space<vmem>>, vector<16x32xbf16>
      tpu.vector_store %arg11[%c0_28, %c0_29], %51 {strides = array<i32>} : memref<16x32xbf16, #tpu.memory_space<vmem>>, vector<16x32xbf16>,
      %cst_30 = arith.constant 0.000000e+00 : f32
      %53 = vector.broadcast %cst_30 : f32 to vector<16x32xf32>
      %c0_31 = arith.constant 0 : index
      %c0_32 = arith.constant 0 : index
      %54 = vector.load %arg10[%c0_31, %c0_32] : memref<16x32xf32, #tpu.memory_space<vmem>>, vector<16x32xf32>
      tpu.vector_store %arg10[%c0_31, %c0_32], %53 {strides = array<i32>} : memref<16x32xf32, #tpu.memory_space<vmem>>, vector<16x32xf32>,
    } else {
    }
    %c0 = arith.constant 0 : index
    %c0_1 = arith.constant 0 : index
    %3 = vector.load %arg11[%c0, %c0_1] : memref<16x32xbf16, #tpu.memory_space<vmem>>, vector<16x32xbf16>
    %c0_2 = arith.constant 0 : index
    %c0_3 = arith.constant 0 : index
    %4 = vector.load %arg5[%c0_2, %c0_3] : memref<32x64xbf16, #tpu.memory_space<vmem>>, vector<32x64xbf16>
    %cst = arith.constant dense<0.000000e+00> : vector<16x64xf32>
    %5 = tpu.matmul %3, %4, %cst {dimension_numbers = #tpu.dot_dimension_numbers<[1], [0], [0], [1], [0, 0, 1, 1], [], []>} : vector<16x32xbf16>, vector<32x64xbf16>, vector<16x64xf32> -> vector<16x64xf32>
    %c0_4 = arith.constant 0 : index
    %c0_5 = arith.constant 0 : index
    %6 = vector.load %arg6[%c0_4, %c0_5] : memref<1x64xf32, #tpu.memory_space<vmem>>, vector<1x64xf32>
    %7 = vector.broadcast %6 : vector<1x64xf32> to vector<16x64xf32>
    %8 = arith.addf %5, %7 : vector<16x64xf32>
    %cst_6 = arith.constant 1.702000e+00 : f32
    %9 = vector.broadcast %cst_6 : f32 to vector<16x64xf32>
    %10 = arith.mulf %9, %8 : vector<16x64xf32>
    %11 = arith.negf %10 : vector<16x64xf32>
    %12 = math.exp %11 : vector<16x64xf32>
    %cst_7 = arith.constant 1.000000e+00 : f32
    %13 = vector.broadcast %cst_7 : f32 to vector<16x64xf32>
    %14 = arith.addf %13, %12 : vector<16x64xf32>
    %15 = arith.divf %13, %14 : vector<16x64xf32>
    %16 = arith.mulf %8, %15 : vector<16x64xf32>
    %c0_8 = arith.constant 0 : index
    %c0_9 = arith.constant 0 : index
    %17 = vector.load %arg10[%c0_8, %c0_9] : memref<16x32xf32, #tpu.memory_space<vmem>>, vector<16x32xf32>
    %18 = arith.truncf %16 : vector<16x64xf32> to vector<16x64xbf16>
    %c0_10 = arith.constant 0 : index
    %c0_11 = arith.constant 0 : index
    %19 = vector.load %arg7[%c0_10, %c0_11] : memref<64x32xbf16, #tpu.memory_space<vmem>>, vector<64x32xbf16>
    %cst_12 = arith.constant dense<0.000000e+00> : vector<16x32xf32>
    %20 = tpu.matmul %18, %19, %cst_12 {dimension_numbers = #tpu.dot_dimension_numbers<[1], [0], [0], [1], [0, 0, 1, 1], [], []>} : vector<16x64xbf16>, vector<64x32xbf16>, vector<16x32xf32> -> vector<16x32xf32>
    %21 = arith.addf %17, %20 : vector<16x32xf32>
    %c0_13 = arith.constant 0 : index
    %c0_14 = arith.constant 0 : index
    %22 = vector.load %arg10[%c0_13, %c0_14] : memref<16x32xf32, #tpu.memory_space<vmem>>, vector<16x32xf32>
    tpu.vector_store %arg10[%c0_13, %c0_14], %21 {strides = array<i32>} : memref<16x32xf32, #tpu.memory_space<vmem>>, vector<16x32xf32>,
    %c0_i32_15 = arith.constant 0 : i32
    %23 = arith.cmpi eq, %arg1, %c0_i32_15 : i32
    %24 = arith.extui %23 : i1 to i32
    %c0_i32_16 = arith.constant 0 : i32
    %25 = arith.cmpi ne, %24, %c0_i32_16 : i32
    scf.if %25 {
      %c0_17 = arith.constant 0 : index
      %c0_18 = arith.constant 0 : index
      %26 = vector.load %arg10[%c0_17, %c0_18] : memref<16x32xf32, #tpu.memory_space<vmem>>, vector<16x32xf32>
      %c0_19 = arith.constant 0 : index
      %c0_20 = arith.constant 0 : index
      %27 = vector.load %arg8[%c0_19, %c0_20] : memref<1x32xf32, #tpu.memory_space<vmem>>, vector<1x32xf32>
      %28 = vector.broadcast %27 : vector<1x32xf32> to vector<16x32xf32>
      %29 = arith.addf %26, %28 : vector<16x32xf32>
      %c0_21 = arith.constant 0 : index
      %c0_22 = arith.constant 0 : index
      %30 = vector.load %arg2[%c0_21, %c0_22] : memref<16x32xf32, #tpu.memory_space<vmem>>, vector<16x32xf32>
      %31 = arith.addf %29, %30 : vector<16x32xf32>
      %c0_23 = arith.constant 0 : index
      %c0_24 = arith.constant 0 : index
      %32 = vector.load %arg9[%c0_23, %c0_24] : memref<16x32xf32, #tpu.memory_space<vmem>>, vector<16x32xf32>
      tpu.vector_store %arg9[%c0_23, %c0_24], %31 {strides = array<i32>} : memref<16x32xf32, #tpu.memory_space<vmem>>, vector<16x32xf32>,
    } else {
    }
    return
  }
  func.func @transform_0(%arg0: i32, %arg1: i32) -> (i32, i32) {
    %c0_i32 = arith.constant 0 : i32
    %c0_i32_0 = arith.constant 0 : i32
    return %arg0, %c0_i32 : i32, i32
  }
  func.func @transform_1(%arg0: i32, %arg1: i32) -> (i32, i32) {
    %c0_i32 = arith.constant 0 : i32
    %c0_i32_0 = arith.constant 0 : i32
    %c0_i32_1 = arith.constant 0 : i32
    return %c0_i32, %c0_i32_0 : i32, i32
  }
  func.func @transform_2(%arg0: i32, %arg1: i32) -> (i32, i32) {
    %c0_i32 = arith.constant 0 : i32
    %c0_i32_0 = arith.constant 0 : i32
    %c0_i32_1 = arith.constant 0 : i32
    return %c0_i32, %c0_i32_0 : i32, i32
  }
  func.func @transform_3(%arg0: i32, %arg1: i32) -> (i32, i32) {
    %c0_i32 = arith.constant 0 : i32
    %c0_i32_0 = arith.constant 0 : i32
    return %c0_i32, %arg1 : i32, i32
  }
  func.func @transform_4(%arg0: i32, %arg1: i32) -> (i32, i32) {
    %c0_i32 = arith.constant 0 : i32
    %c0_i32_0 = arith.constant 0 : i32
    return %c0_i32, %arg1 : i32, i32
  }
  func.func @transform_5(%arg0: i32, %arg1: i32) -> (i32, i32) {
    %c0_i32 = arith.constant 0 : i32
    %c0_i32_0 = arith.constant 0 : i32
    return %arg1, %c0_i32 : i32, i32
  }
  func.func @transform_6(%arg0: i32, %arg1: i32) -> (i32, i32) {
    %c0_i32 = arith.constant 0 : i32
    %c0_i32_0 = arith.constant 0 : i32
    %c0_i32_1 = arith.constant 0 : i32
    return %c0_i32, %c0_i32_0 : i32, i32
  }
  func.func @transform_7(%arg0: i32, %arg1: i32) -> (i32, i32) {
    %c0_i32 = arith.constant 0 : i32
    %c0_i32_0 = arith.constant 0 : i32
    return %arg0, %c0_i32 : i32, i32
  }
}

module attributes {stable_mosaic.version = 11 : i64} {
  func.func @_matmul_bias_kernel(%arg0: i32, %arg1: memref<8x32xbf16, #tpu.memory_space<vmem>>, %arg2: memref<32x24xbf16, #tpu.memory_space<vmem>>, %arg3: memref<1x24xf32, #tpu.memory_space<vmem>>, %arg4: memref<8x24xf32, #tpu.memory_space<vmem>>) attributes {dimension_semantics = [#tpu.dimension_semantics<parallel>], iteration_bounds = array<i64: 1>, scalar_prefetch = 0 : i64, scratch_operands = 0 : i64, tpu.core_type = #tpu.core_type<tc>, window_params = [{transform_indices = @transform_0, window_bounds = array<i64: 8, 32>}, {pipeline_mode = #tpu.pipeline_mode<synchronous>, transform_indices = @transform_1, window_bounds = array<i64: 32, 24>}, {pipeline_mode = #tpu.pipeline_mode<synchronous>, transform_indices = @transform_2, window_bounds = array<i64: 1, 24>}, {transform_indices = @transform_3, window_bounds = array<i64: 8, 24>}]} {
    %c0 = arith.constant 0 : index
    %c0_0 = arith.constant 0 : index
    %0 = vector.load %arg1[%c0, %c0_0] : memref<8x32xbf16, #tpu.memory_space<vmem>>, vector<8x32xbf16>
    %c0_1 = arith.constant 0 : index
    %c0_2 = arith.constant 0 : index
    %1 = vector.load %arg2[%c0_1, %c0_2] : memref<32x24xbf16, #tpu.memory_space<vmem>>, vector<32x24xbf16>
    %cst = arith.constant dense<0.000000e+00> : vector<8x24xf32>
    %2 = tpu.matmul %0, %1, %cst {dimension_numbers = #tpu.dot_dimension_numbers<[1], [0], [0], [1], [0, 0, 1, 1], [], []>} : vector<8x32xbf16>, vector<32x24xbf16>, vector<8x24xf32> -> vector<8x24xf32>
    %c0_3 = arith.constant 0 : index
    %c0_4 = arith.constant 0 : index
    %3 = vector.load %arg3[%c0_3, %c0_4] : memref<1x24xf32, #tpu.memory_space<vmem>>, vector<1x24xf32>
    %4 = vector.broadcast %3 : vector<1x24xf32> to vector<8x24xf32>
    %5 = arith.addf %2, %4 : vector<8x24xf32>
    %c0_5 = arith.constant 0 : index
    %c0_6 = arith.constant 0 : index
    %6 = vector.load %arg4[%c0_5, %c0_6] : memref<8x24xf32, #tpu.memory_space<vmem>>, vector<8x24xf32>
    tpu.vector_store %arg4[%c0_5, %c0_6], %5 {strides = array<i32>} : memref<8x24xf32, #tpu.memory_space<vmem>>, vector<8x24xf32>,
    return
  }
  func.func @transform_0(%arg0: i32) -> (i32, i32) {
    %c0_i32 = arith.constant 0 : i32
    %c0_i32_0 = arith.constant 0 : i32
    return %arg0, %c0_i32 : i32, i32
  }
  func.func @transform_1(%arg0: i32) -> (i32, i32) {
    %c0_i32 = arith.constant 0 : i32
    %c0_i32_0 = arith.constant 0 : i32
    %c0_i32_1 = arith.constant 0 : i32
    return %c0_i32, %c0_i32_0 : i32, i32
  }
  func.func @transform_2(%arg0: i32) -> (i32, i32) {
    %c0_i32 = arith.constant 0 : i32
    %c0_i32_0 = arith.constant 0 : i32
    %c0_i32_1 = arith.constant 0 : i32
    return %c0_i32, %c0_i32_0 : i32, i32
  }
  func.func @transform_3(%arg0: i32) -> (i32, i32) {
    %c0_i32 = arith.constant 0 : i32
    %c0_i32_0 = arith.constant 0 : i32
    return %arg0, %c0_i32 : i32, i32
  }
}

</mosaic_0001>

<bundles_post_ra>
// kernel: run.11
= control target key start
LH: loop header
LB: loop body
LE: loop exit
PB: predicated region body
PF: predicated region fallthrough
CT: control target
= control target key end

     0   :  { %vm25_vm0 = vcmask 261120   ;;  %v181_v15 = vmov 0.0   ;;  %vm182_vm1 = vmmov 0   ;;  %vm145_vm2 = vcmask 781312   ;;  %s245_s0 = inlined_call_operand.vmem [shape: f32[16,32], index: 0, kind: input, shape index: {}]   ;;  %s246_s3 = inlined_call_operand.vmem [shape: bf16[32,96], index: 3, kind: input, shape index: {}]   ;;  %s247_s1 = inlined_call_operand.vmem [shape: f32[1,32], index: 1, kind: input, shape index: {}]   ;;  %s248_s2 = inlined_call_operand.vmem [shape: f32[1,32], index: 2, kind: input, shape index: {}]   ;;  %s249_s4 = inlined_call_operand.vmem [shape: f32[1,96], index: 4, kind: input, shape index: {}]   ;;  %s250_s5 = inlined_call_operand.vmem [shape: bf16[16,96], index: 5, kind: output, shape index: {}]  }
   0x1   :  { %v21_v0 = vld [vmem:[%s245_s0] sm:$0xff]  ;;  %v22_v1 = vld [vmem:[%s245_s0 + $0x8] sm:$0xff]  ;;  %165 = vmatprep.subr.bf16.mxu0 %v181_v15  ;;  %169 = vmatprep.mubr.msk.bf16.mxu0 %vm182_vm1, %v181_v15 }
   0x2   :  { %v26_v2 = vsel %vm25_vm0, %v21_v0, 0.0  ;;  %v29_v3 = vsel %vm25_vm0, %v22_v1, 0.0  ;;  %v175_v14 = vld [vmem:[%s246_s3] sm:$0xff]   ;;  %v176_v16 = vld [vmem:[%s246_s3 + $0x8] sm:$0xff]  }
   0x3   :  { %27 = vadd.xlane.f32.xlu0 %v26_v2  ;;  %166 = vmatpush3.bf16.msra.mxu0 %v175_v14  ;;  %v152_v25 = vld [vmem:[%s247_s1] ss:$0 sm:$0xff] }
   0x4   :  { %167 = vmatprep.subr.bf16.mxu0 %v181_v15  ;;  %v153_v29 = vld [vmem:[%s248_s2] ss:$0 sm:$0xff] }
   0x5   :  { %v154_v34 = vld [vmem:[%s249_s4] ss:$0 sm:$0xff] }
   0x7   :  { %30 = vadd.xlane.f32.xlu0 %v29_v3  ;;  %168 = vmatpush3.bf16.msra.mxu0 %v176_v16 }
  0x90   :  { %v28_v4 = vpop.xlane.xlu0 %27 }
  0x91   :  { %v33_v5 = vmul.f32 0.03125, %v28_v4 }
  0x93   :  { %v35_v6 = vsub.f32 %v21_v0, %v33_v5 }
  0x94   :  { %v31_v7 = vpop.xlane.xlu0 %30 }
  0x95   :  { %v34_v8 = vmul.f32 0.03125, %v31_v7  ;;  %v37_v9 = vmul.f32 %v35_v6, %v35_v6 }
  0x97   :  { %v36_v10 = vsub.f32 %v22_v1, %v34_v8  ;;  %v39_v11 = vsel %vm25_vm0, %v37_v9, 0.0 }
  0x98   :  { %40 = vadd.xlane.f32.xlu1 %v39_v11 }
  0x99   :  { %v38_v12 = vmul.f32 %v36_v10, %v36_v10 }
  0x9b   :  { %v42_v13 = vsel %vm25_vm0, %v38_v12, 0.0 }
  0x9c   :  { %43 = vadd.xlane.f32.xlu1 %v42_v13 }
 0x125   :  { %v41_v17 = vpop.xlane.xlu1 %40 }
 0x126   :  { %v45_v18 = vmul.f32 0.03125, %v41_v17 }
 0x128   :  { %v47_v19 = vadd.f32 1e-05, %v45_v18 }
 0x129   :  { %v44_v20 = vpop.xlane.xlu1 %43 }
 0x12a   :  { %177 = vrsqrt.f32 %v47_v19  ;;  %v46_v21 = vmul.f32 0.03125, %v44_v20 }
 0x12c   :  { %v48_v22 = vadd.f32 1e-05, %v46_v21 }
 0x12e   :  { %179 = vrsqrt.f32 %v48_v22 }
 0x134   :  { %v178_v23 = vpop.eup %177 }
 0x135   :  { %v51_v24 = vmul.f32 %v178_v23, %v35_v6 }
 0x137   :  { %v59_v28 = vmul.f32 %v152_v25, %v51_v24 }
 0x138   :  { %v180_v26 = vpop.eup %179 }
 0x139   :  { %v52_v27 = vmul.f32 %v180_v26, %v36_v10  ;;  %v67_v31 = vadd.f32 %v153_v29, %v59_v28 }
 0x13b   :  { %v60_v30 = vmul.f32 %v152_v25, %v52_v27 }
 0x13d   :  { %v68_v32 = vadd.f32 %v153_v29, %v60_v30 }
 0x13f   :  { %v69_v33 = vpack.c.bf16 %v68_v32, %v67_v31 }
 0x141   :  { %170 = vmatmul.mubr.msk.bf16.vlgmr.msra.gmra.mrb[0].mxu0 %vm25_vm0, %v69_v33 }
 0x214   :  { %v130_v35 = vpop.f32.mrb[0].mxu0 }
 0x215   :  { %v131_v36 = vadd.f32 %v154_v34, %v130_v35  ;;  %v171_v37 = vpop.f32.mrb[1].mxu0 }
 0x216   :  { %v133_v38 = vpop.f32.mrb[2].mxu0 }
 0x217   :  { %v160_v39 = vpack.c.bf16 %v131_v36, %v131_v36  ;;  %v134_v40 = vadd.f32 %v154_v34, %v133_v38  ;;  %v172_v41 = vpop.f32.mrb[3].mxu0 }
 0x219   :  { %146 = vst.msk [vmem:[%s250_s5] sm:$0xf] %vm145_vm2, %v160_v39  ;;  %v161_v42 = vpack.c.bf16 %v134_v40, %v134_v40 }
 0x21b   :  { %147 = vst.msk [vmem:[%s250_s5 + $0x4] sm:$0xf] %vm145_vm2, %v161_v42 }

// kernel: run.10
= control target key start
LH: loop header
LB: loop body
LE: loop exit
PB: predicated region body
PF: predicated region fallthrough
CT: control target
= control target key end

     0   :  { %vm18_vm0 = vcmask 261120   ;;  %s118_s0 = inlined_call_operand.vmem [shape: f32[16,32], index: 0, kind: input, shape index: {}]   ;;  %s119_s1 = inlined_call_operand.vmem [shape: f32[1,32], index: 1, kind: input, shape index: {}]   ;;  %s120_s2 = inlined_call_operand.vmem [shape: f32[1,32], index: 2, kind: input, shape index: {}]   ;;  %s121_s3 = inlined_call_operand.vmem [shape: f32[16,32], index: 3, kind: output, shape index: {}]  }
   0x1   :  { %v14_v0 = vld [vmem:[%s118_s0] sm:$0xff]  ;;  %v15_v1 = vld [vmem:[%s118_s0 + $0x8] sm:$0xff] }
   0x2   :  { %v19_v2 = vsel %vm18_vm0, %v14_v0, 0.0  ;;  %v22_v3 = vsel %vm18_vm0, %v15_v1, 0.0  ;;  %v68_v21 = vld [vmem:[%s119_s1] ss:$0 sm:$0xff] }
   0x3   :  { %20 = vadd.xlane.f32.xlu0 %v19_v2  ;;  %v69_v23 = vld [vmem:[%s120_s2] ss:$0 sm:$0xff] }
   0x7   :  { %23 = vadd.xlane.f32.xlu0 %v22_v3 }
  0x90   :  { %v21_v4 = vpop.xlane.xlu0 %20 }
  0x91   :  { %v26_v5 = vmul.f32 0.03125, %v21_v4 }
  0x93   :  { %v28_v6 = vsub.f32 %v14_v0, %v26_v5 }
  0x94   :  { %v24_v7 = vpop.xlane.xlu0 %23 }
  0x95   :  { %v27_v8 = vmul.f32 0.03125, %v24_v7  ;;  %v30_v9 = vmul.f32 %v28_v6, %v28_v6 }
  0x97   :  { %v29_v10 = vsub.f32 %v15_v1, %v27_v8  ;;  %v32_v11 = vsel %vm18_vm0, %v30_v9, 0.0 }
  0x98   :  { %33 = vadd.xlane.f32.xlu1 %v32_v11 }
  0x99   :  { %v31_v12 = vmul.f32 %v29_v10, %v29_v10 }
  0x9b   :  { %v35_v13 = vsel %vm18_vm0, %v31_v12, 0.0 }
  0x9c   :  { %36 = vadd.xlane.f32.xlu1 %v35_v13 }
 0x125   :  { %v34_v14 = vpop.xlane.xlu1 %33 }
 0x126   :  { %v38_v15 = vmul.f32 0.03125, %v34_v14 }
 0x128   :  { %v40_v16 = vadd.f32 1e-05, %v38_v15 }
 0x129   :  { %v37_v17 = vpop.xlane.xlu1 %36 }
 0x12a   :  { %70 = vrsqrt.f32 %v40_v16  ;;  %v39_v18 = vmul.f32 0.03125, %v37_v17 }
 0x12c   :  { %v41_v19 = vadd.f32 1e-05, %v39_v18 }
 0x12e   :  { %72 = vrsqrt.f32 %v41_v19 }
 0x134   :  { %v71_v20 = vpop.eup %70 }
 0x135   :  { %v44_v22 = vmul.f32 %v71_v20, %v28_v6 }
 0x137   :  { %v52_v24 = vmul.f32 %v68_v21, %v44_v22 }
 0x138   :  { %v73_v25 = vpop.eup %72 }
 0x139   :  { %v60_v26 = vadd.f32 %v69_v23, %v52_v24  ;;  %v45_v27 = vmul.f32 %v73_v25, %v29_v10 }
 0x13b   :  { %62 = vst.msk [vmem:[%s121_s3] sm:$0xff] %vm18_vm0, %v60_v26  ;;  %v53_v28 = vmul.f32 %v68_v21, %v45_v27 }
 0x13d   :  { %v61_v29 = vadd.f32 %v69_v23, %v53_v28 }
 0x13f   :  { %63 = vst.msk [vmem:[%s121_s3 + $0x8] sm:$0xff] %vm18_vm0, %v61_v29 }

// kernel: run.9
= control target key start
LH: loop header
LB: loop body
LE: loop exit
PB: predicated region body
PF: predicated region fallthrough
CT: control target
= control target key end

     0   :  { %vm188_vm0 = vcmask 261120   ;;  %s321_s1 = inlined_call_operand.vmem [shape: bf16[256,32], index: 1, kind: input, shape index: {}]   ;;  %s322_s0 = inlined_call_operand.vmem [shape: bf16[8,256], index: 0, kind: input, shape index: {}]   ;;  %s323_s2 = inlined_call_operand.vmem [shape: f32[8,32], index: 2, kind: output, shape index: {}]  }
   0x1   :  { %v234_v0 = vld [vmem:[%s321_s1 + $0x40] sm:$0xff]   ;;  %v236_v2 = vld [vmem:[%s321_s1 + $0x48] sm:$0xff]   ;;  %v238_v4 = vld [vmem:[%s321_s1 + $0x50] sm:$0xff]  }
   0x2   :  { %v235_v1 = vld [vmem:[%s321_s1] sm:$0xff]   ;;  %212 = vmatprep.subr.bf16.mxu0 %v234_v0  ;;  %v237_v3 = vld [vmem:[%s321_s1 + $0x8] sm:$0xff]   ;;  %v239_v5 = vld [vmem:[%s321_s1 + $0x10] sm:$0xff]  }
   0x3   :  { %213 = vmatpush3.bf16.msra.mxu0 %v235_v1  ;;  %v240_v6 = vld [vmem:[%s321_s1 + $0x58] sm:$0xff]   ;;  %v242_v8 = vld [vmem:[%s321_s1 + $0x60] sm:$0xff]   ;;  %v244_v10 = vld [vmem:[%s321_s1 + $0x68] sm:$0xff]  }
   0x4   :  { %214 = vmatprep.subr.bf16.mxu0 %v236_v2  ;;  %v241_v7 = vld [vmem:[%s321_s1 + $0x18] sm:$0xff]   ;;  %v243_v9 = vld [vmem:[%s321_s1 + $0x20] sm:$0xff]   ;;  %v245_v13 = vld [vmem:[%s321_s1 + $0x28] sm:$0xff]  }
   0x5   :  { %v12_v11 = vld [vmem:[%s322_s0] sm:$0xff]  ;;  %v246_v14 = vld [vmem:[%s321_s1 + $0x70] sm:$0xff]   ;;  %v248_v16 = vld [vmem:[%s321_s1 + $0x78] sm:$0xff]  }
   0x6   :  { %v195_v12 = vcombine.high %v12_v11, %v12_v11  ;;  %v247_v15 = vld [vmem:[%s321_s1 + $0x30] sm:$0xff]   ;;  %v249_v17 = vld [vmem:[%s321_s1 + $0x38] sm:$0xff]   ;;  %v194_v18 = vcombine.low %v12_v11, %v12_v11 }
   0x7   :  { %215 = vmatpush3.bf16.msra.mxu0 %v237_v3 }
   0x8   :  { %216 = vmatprep.subr.bf16.mxu0 %v238_v4  ;;  %180 = vmatprep.mubr.bf16.mxu0 %v195_v12 }
   0xb   :  { %217 = vmatpush3.bf16.msra.mxu0 %v239_v5 }
   0xc   :  { %218 = vmatprep.subr.bf16.mxu0 %v240_v6 }
   0xf   :  { %219 = vmatpush3.bf16.msra.mxu0 %v241_v7 }
  0x10   :  { %220 = vmatprep.subr.bf16.mxu0 %v242_v8 }
  0x13   :  { %221 = vmatpush3.bf16.msra.mxu0 %v243_v9 }
  0x14   :  { %222 = vmatprep.subr.bf16.mxu0 %v244_v10 }
  0x17   :  { %223 = vmatpush3.bf16.msra.mxu0 %v245_v13 }
  0x18   :  { %224 = vmatprep.subr.bf16.mxu0 %v246_v14 }
  0x1b   :  { %225 = vmatpush3.bf16.msra.mxu0 %v247_v15 }
  0x1c   :  { %226 = vmatprep.subr.bf16.mxu0 %v248_v16 }
  0x1f   :  { %227 = vmatpush3.bf16.msra.mxu0 %v249_v17 }
  0x22   :  { %181 = vmatmul.mubr.bf16.vlgmr.msra.gmra.mrb[0].mxu0 %v194_v18 }
  0xf5   :  { %v228_v19 = vpop.f32.mrb[0].mxu0 }
  0xf6   :  { %v229_v20 = vpop.f32.mrb[1].mxu0 }
  0xf7   :  { %v230_v21 = vadd.f32 %v229_v20, %v228_v19  ;;  %v231_v22 = vpop.f32.mrb[2].mxu0 }
  0xf8   :  { %v232_v23 = vpop.f32.mrb[3].mxu0 }
  0xf9   :  { %189 = vst.msk [vmem:[%s323_s2] sm:$0xff] %vm188_vm0, %v230_v21 }

// kernel: run.12
= control target key start
LH: loop header
LB: loop body
LE: loop exit
PB: predicated region body
PF: predicated region fallthrough
CT: control target
= control target key end

     0   :  { %s1142_s15 = smov 0   ;;  %s1144_s16 = smov 0   ;;  %s1267_s0 = inlined_call_operand.vmem [shape: bf16[2,8,96], index: 0, kind: input, shape index: {}]   ;;  %s1268_s1 = inlined_call_operand.vmem [shape: bf16[32,32], index: 1, kind: input, shape index: {}]   ;;  %s1269_s2 = inlined_call_operand.vmem [shape: f32[1,32], index: 2, kind: input, shape index: {}]   ;;  %s1270_s3 = inlined_call_operand.vmem [shape: f32[2,8,32], index: 3, kind: input, shape index: {}]   ;;  %s1271_s4 = inlined_call_operand.vmem [shape: f32[2,8,32], index: 4, kind: output, shape index: {}]  }
   0x1   :  { %s1146_s17 = smov 0  }
   0x2 LB: > { %s26_s18 = sadd.s32 1, %s1094_s16  ;;  %p916_p0 = scmp.ge.s32.totalorder %s1098_s17, 1  ;;  %s1098_s17 = sphi %s1146_s17, %s14_s17   ;;  %s1094_s16 = sphi %s1144_s16, %s1273_s16   ;;  %s1090_s15 = sphi %s1142_s15, %s1272_s15  }
   0x3   : > { %p28_p1 = scmp.ge.s32.totalorder %s26_s18, 2  ;;  %p198_p2 = scmp.lt.s32.totalorder %s1098_s17, 3 }
   0x5   : > { %s1275_s18 = smov (%p28_p1, %s26_s18), 0  ;;  %p199_p3 = pnand %p916_p0, %p198_p2 }
   0x6   : > { %p234_p4 = scmp.lt.s32.totalorder (!%p199_p3), %s1090_s15, 1  ;;  %v1100_v0 = vmov (!%p199_p3), 0.0   ;;  %vm1101_vm0 = vmmov (!%p199_p3), 0   ;;  %s1102_s23 = smov (!%p199_p3), 96   ;;  %vm272_vm1 = vcmask (!%p199_p3), 64512   ;;  %v263_v5 = vlaneseq (!%p199_p3) }
   0x7   : > { %202 = sbr.rel (%p199_p3) target bundleno = 1836 (0x72c), region = 36  ;;  %960 = vmatprep.subr.bf16.mxu0 (!%p199_p3), %v1100_v0  ;;  %962 = vmatprep.mubr.msk.bf16.mxu0 (!%p199_p3), %vm1101_vm0, %v1100_v0  ;;  %s1103_s24 = smov (!%p199_p3), 64   ;;  %v1105_v7 = vmov (!%p199_p3), -1e+30   ;;  %vm336_vm3 = vcmask (!%p199_p3), 1043456   ;;  %vm381_vm4 = vcmask (!%p199_p3), 60416  }
   0x8   : > { %966 = vmatprep.subr.bf16.mxu1 (!%p199_p3), %v1100_v0  ;;  %968 = vmatprep.mubr.msk.bf16.mxu1 (!%p199_p3), %vm1101_vm0, %v1100_v0  ;;  %s1104_s25 = smov (!%p199_p3), 88   ;;  %v264_v6 = vand.u32 (!%p199_p3), 127, %v263_v5  ;;  %s1106_s26 = smov (!%p199_p3), 72   ;;  %vm260_vm5 = vcmask (!%p199_p3), 261120   ;;  %vm500_vm6 = vcmask (!%p199_p3), 126016   ;;  %vm619_vm7 = vcmask (!%p199_p3), 191616  }
   0x9   : > { %s1107_s27 = smov (!%p199_p3), 120   ;;  %s1108_s28 = smov (!%p199_p3), 80   ;;  %261 = vst.msk [vmem:[#allocation2] sm:$0xff] (!%p199_p3), %vm260_vm5, %v1100_v0  ;;  %vm738_vm8 = vcmask (!%p199_p3), 257216  }
   0xa   : > { %vm265_vm2 = vcmp.lt.s32.totalorder (!%p199_p3), %v264_v6, 5  ;;  %s1109_s29 = smov (!%p199_p3), 112   ;;  %s1110_s30 = smov (!%p199_p3), 104  }
   0xb   : > { %v1182_v8 = vsel (!%p199_p3), %vm265_vm2, 0.0, %v1105_v7  ;;  %s1111_s5 = smov (!%p199_p3), 56   ;;  %s1112_s6 = smov (!%p199_p3), 48  }
   0xc   : > { %s1113_s7 = smov (!%p199_p3), 40   ;;  %s1114_s8 = smov (!%p199_p3), 8  }
   0xd   : > { %s1115_s13 = smov (!%p199_p3), 16   ;;  %s1116_s14 = smov (!%p199_p3), 24  }
   0xe   : > { %s1277_s15 = smov (!%p234_p4, %s1090_s15), 1 }
   0xf   : > { %s917_s19 = sshll.u32 %s1277_s15, 2 }
  0x10   : > { %s240_s22 = scalar_lea.vmem %s1267_s0, %s917_s19  ;;  %s918_s19 = sshll.u32 %s1277_s15, 3 }
  0x11   : > { %v262_v1 = vld [vmem:[%s240_s22] sm:$0xf]  ;;  %s250_s22 = scalar_lea.vmem %s1270_s3, %s918_s19 }
  0x12   : > { %v1172_v2 = vcombine.low %v262_v1, %v262_v1 }
  0x14   : > { %270 = vrot.lane.b32.xlu0 %v1172_v2, %s1102_s23  ;;  %331 = vrot.lane.b32.xlu1 %v1172_v2, %s1103_s24 }
  0x18   : > { %385 = vrot.lane.b32.xlu1 %v1172_v2, %s1104_s25 }
  0x86   : > { %v271_v3 = vpop.permute.xlu0 %270  ;;  %v332_v15 = vpop.permute.xlu1 %331 }
  0x87   : > { %v277_v4 = vsel %vm272_vm1, %v271_v3, 0  ;;  %v338_v16 = vsel %vm336_vm3, %v332_v15, 0 }
  0x88   : > { %961 = vmatpush3.bf16.xpose.msra.mxu0 %v277_v4  ;;  %967 = vmatpush3.bf16.msra.mxu1 %v338_v16 }
  0x89   : > { %978 = vmatprep.subr.bf16.mxu0 %v1100_v0  ;;  %972 = vmatprep.subr.bf16.mxu1 %v1100_v0 }
  0x8a   : > { %v386_v22 = vpop.permute.xlu1 %385 }
  0x8b   : > { %v391_v28 = vsel %vm272_vm1, %v386_v22, 0 }
  0x8f   : > { %963 = vmatmul.mubr.msk.bf16.vlgmr.msra.gmra.mrb[0].mxu0 %vm272_vm1, %v262_v1 }
  0x90   : > { %980 = vmatprep.mubr.msk.bf16.mxu0 %vm1101_vm0, %v1100_v0 }
 0x162   : > { %v313_v9 = vpop.f32.mrb[0].mxu0 }
 0x163   : > { %v314_v10 = vadd.f32 %v313_v9, %v1182_v8  ;;  %v964_v11 = vpop.f32.mrb[1].mxu0 }
 0x164   : > { %v316_v12 = vpop.f32.mrb[2].mxu0 }
 0x165   : > { %v965_v13 = vpop.f32.mrb[3].mxu0  ;;  %v319_v14 = vsel %vm272_vm1, %v314_v10, -inf }
 0x166   : > { %320 = vmax.xlane.f32.xlu0 %v319_v14 }
 0x17c   : > { %623 = vrot.lane.b32.xlu0 %v1172_v2, %s1106_s26 }
 0x1f3   : > { %v321_v17 = vpop.xlane.xlu0 %320 }
 0x1f4   : > { %v322_v18 = vsub.f32 %v314_v10, %v321_v17 }
 0x1f6   : > { %v323_v19 = vmul.f32 1.442695, %v322_v18 }
 0x1f7   : > { %v624_v31 = vpop.permute.xlu0 %623 }
 0x1f8   : > { %1060 = vpow2.f32 %v323_v19  ;;  %v629_v33 = vsel %vm272_vm1, %v624_v31, 0 }
 0x202   : > { %v1061_v20 = vpop.eup %1060 }
 0x203   : > { %v325_v21 = vsel %vm272_vm1, %v1061_v20, 0.0 }
 0x204   : > { %326 = vadd.xlane.f32.xlu1 %v325_v21 }
 0x215   : > { %383 = vrot.lane.b32.xlu1 %v1172_v2, %s1107_s27  ;;  %s254_s27 = scalar_lea.vmem %s1271_s4, %s918_s19 }
 0x219   : > { %504 = vrot.lane.b32.xlu1 %v1172_v2, %s1108_s28 }
 0x21d   : > { %502 = vrot.lane.b32.xlu1 %v1172_v2, %s1109_s29 }
 0x221   : > { %621 = vrot.lane.b32.xlu1 %v1172_v2, %s1110_s30 }
 0x291   : > { %v327_v23 = vpop.xlane.xlu1 %326 }
 0x292   : > { %1062 = vrcp.f32 %v327_v23 }
 0x295   : > { %v384_v26 = vpop.permute.xlu1 %383 }
 0x299   : > { %v505_v29 = vpop.permute.xlu1 %504 }
 0x29a   : > { %v510_v30 = vsel %vm272_vm1, %v505_v29, 0 }
 0x29c   : > { %v1063_v24 = vpop.eup %1062 }
 0x29d   : > { %v329_v25 = vmul.f32 %v1063_v24, %v1061_v20  ;;  %v503_v32 = vpop.permute.xlu1 %502 }
 0x29f   : > { %v330_v27 = vpack.c.bf16 %v329_v25, %v329_v25 }
 0x2a1   : > { %969 = vmatmul.mubr.msk.bf16.vlgmr.msra.gmra.mrb[0].mxu1 %vm272_vm1, %v330_v27  ;;  %v622_v34 = vpop.permute.xlu1 %621 }
 0x2a2   : > { %973 = vmatpush3.bf16.xpose.msra.mxu1 %v391_v28  ;;  %974 = vmatprep.mubr.msk.bf16.mxu1 %vm1101_vm0, %v1100_v0 }
 0x2a3   : > { %984 = vmatprep.subr.bf16.mxu1 %v1100_v0 }
 0x2a9   : > { %975 = vmatmul.mubr.msk.bf16.vlgmr.msra.gmra.mrb[4].mxu1 %vm272_vm1, %v384_v26 }
 0x2aa   : > { %985 = vmatpush3.bf16.xpose.msra.mxu1 %v510_v30  ;;  %986 = vmatprep.mubr.msk.bf16.mxu1 %vm1101_vm0, %v1100_v0 }
 0x2ab   : > { %996 = vmatprep.subr.bf16.mxu1 %v1100_v0 }
 0x2b1   : > { %987 = vmatmul.mubr.msk.bf16.vlgmr.msra.gmra.mrb[8].mxu1 %vm272_vm1, %v503_v32 }
 0x2b2   : > { %997 = vmatpush3.bf16.xpose.msra.mxu1 %v629_v33  ;;  %998 = vmatprep.mubr.msk.bf16.mxu1 %vm1101_vm0, %v1100_v0  ;;  %v1058_v33 = vld [vmem:[%s1268_s1] sm:$0xff]  }
 0x2b3   : > { %1008 = vmatprep.subr.bf16.mxu1 %v1100_v0 }
 0x2b9   : > { %999 = vmatmul.mubr.msk.bf16.vlgmr.msra.gmra.mrb[12].mxu1 %vm272_vm1, %v622_v34 }
 0x2ba   : > { %1012 = vmatprep.mubr.msk.bf16.mxu1 %vm1101_vm0, %v1100_v0  ;;  %1009 = vmatpush3.bf16.msra.mxu1 %v1058_v33 }
 0x2bb   : > { %1010 = vmatprep.subr.bf16.mxu1 %v1100_v0 }
 0x374   : > { %v374_v35 = vpop.f32.mrb[0].mxu1 }
 0x375   : > { %v380_v36 = vpack.c.bf16 %v374_v35, %v374_v35  ;;  %v970_v37 = vpop.f32.mrb[1].mxu1  ;;  %v1059_v35 = vld [vmem:[%s1268_s1 + $0x8] sm:$0xff]  }
 0x376   : > { %v377_v38 = vpop.f32.mrb[2].mxu1  ;;  %1011 = vmatpush3.bf16.msra.mxu1 %v1059_v35 }
 0x377   : > { %382 = vst.msk [vmem:[#allocation3] sm:$0xf] %vm381_vm4, %v380_v36  ;;  %v971_v39 = vpop.f32.mrb[3].mxu1 }
 0x37c   : > { %v427_v40 = vpop.f32.mrb[4].mxu1 }
 0x37d   : > { %v428_v41 = vadd.f32 %v427_v40, %v1182_v8  ;;  %v976_v42 = vpop.f32.mrb[5].mxu1 }
 0x37e   : > { %v430_v43 = vpop.f32.mrb[6].mxu1 }
 0x37f   : > { %v977_v44 = vpop.f32.mrb[7].mxu1  ;;  %v433_v45 = vsel %vm272_vm1, %v428_v41, -inf }
 0x380   : > { %434 = vmax.xlane.f32.xlu1 %v433_v45 }
 0x384   : > { %v546_v46 = vpop.f32.mrb[8].mxu1 }
 0x385   : > { %v547_v47 = vadd.f32 %v546_v46, %v1182_v8  ;;  %v988_v48 = vpop.f32.mrb[9].mxu1 }
 0x386   : > { %v549_v49 = vpop.f32.mrb[10].mxu1  ;;  %v740_v48 = vld [vmem:[#allocation2] sm:$0xff] }
 0x387   : > { %v552_v50 = vsel %vm272_vm1, %v547_v47, -inf  ;;  %v989_v51 = vpop.f32.mrb[11].mxu1 }
 0x388   : > { %553 = vmax.xlane.f32.xlu0 %v552_v50 }
 0x38c   : > { %v665_v52 = vpop.f32.mrb[12].mxu1 }
 0x38d   : > { %v666_v53 = vadd.f32 %v665_v52, %v1182_v8  ;;  %v1000_v54 = vpop.f32.mrb[13].mxu1 }
 0x38e   : > { %v668_v55 = vpop.f32.mrb[14].mxu1  ;;  %v935_v54 = vld [vmem:[%s1269_s2] ss:$0 sm:$0xff] }
 0x38f   : > { %v671_v56 = vsel %vm272_vm1, %v666_v53, -inf  ;;  %v1001_v57 = vpop.f32.mrb[15].mxu1 }
 0x390   : > { %672 = vmax.xlane.f32.xlu1 %v671_v56  ;;  %v816_v56 = vld [vmem:[%s250_s22] sm:$0xff] }
 0x40d   : > { %v435_v58 = vpop.xlane.xlu1 %434 }
 0x40e   : > { %v436_v59 = vsub.f32 %v428_v41, %v435_v58 }
 0x410   : > { %v437_v60 = vmul.f32 1.442695, %v436_v59 }
 0x412   : > { %1064 = vpow2.f32 %v437_v60 }
 0x415   : > { %v554_v6 = vpop.xlane.xlu0 %553 }
 0x416   : > { %v555_v7 = vsub.f32 %v547_v47, %v554_v6 }
 0x418   : > { %v556_v8 = vmul.f32 1.442695, %v555_v7 }
 0x41c   : > { %v1065_v61 = vpop.eup %1064 }
 0x41d   : > { %v673_v62 = vpop.xlane.xlu1 %672  ;;  %v439_v63 = vsel %vm272_vm1, %v1065_v61, 0.0 }
 0x41e   : > { %v674_v1 = vsub.f32 %v666_v53, %v673_v62  ;;  %440 = vadd.xlane.f32.xlu1 %v439_v63 }
 0x420   : > { %v675_v3 = vmul.f32 1.442695, %v674_v1 }
 0x422   : > { %1066 = vpow2.f32 %v675_v3 }
 0x423   : > { %1068 = vpow2.f32 %v556_v8 }
 0x42c   : > { %v1067_v4 = vpop.eup %1066 }
 0x42d   : > { %v677_v5 = vsel %vm272_vm1, %v1067_v4, 0.0  ;;  %v1069_v9 = vpop.eup %1068 }
 0x42e   : > { %678 = vadd.xlane.f32.xlu0 %v677_v5  ;;  %v558_v10 = vsel %vm272_vm1, %v1069_v9, 0.0 }
 0x42f   : > { %445 = vrot.lane.b32.xlu1 %v1172_v2, %s1111_s5 }
 0x444   : > { %564 = vrot.lane.b32.xlu0 %v1172_v2, %s1112_s6 }
 0x453   : > { %559 = vadd.xlane.f32.xlu1 %v558_v10 }
 0x464   : > { %683 = vrot.lane.b32.xlu1 %v1172_v2, %s1113_s7 }
 0x4ab   : > { %v441_v11 = vpop.xlane.xlu1 %440 }
 0x4ac   : > { %1070 = vrcp.f32 %v441_v11 }
 0x4af   : > { %v446_v12 = vpop.permute.xlu1 %445 }
 0x4b0   : > { %v451_v13 = vsel %vm336_vm3, %v446_v12, 0 }
 0x4b1   : > { %979 = vmatpush3.bf16.msra.mxu0 %v451_v13 }
 0x4b2   : > { %990 = vmatprep.subr.bf16.mxu0 %v1100_v0 }
 0x4b6   : > { %v1071_v14 = vpop.eup %1070 }
 0x4b7   : > { %v443_v15 = vmul.f32 %v1071_v14, %v1065_v61 }
 0x4b9   : > { %v444_v16 = vpack.c.bf16 %v443_v15, %v443_v15 }
 0x4bb   : > { %981 = vmatmul.mubr.msk.bf16.vlgmr.msra.gmra.mrb[4].mxu0 %vm272_vm1, %v444_v16  ;;  %v679_v17 = vpop.xlane.xlu0 %678 }
 0x4bc   : > { %992 = vmatprep.mubr.msk.bf16.mxu0 %vm1101_vm0, %v1100_v0 }
 0x4bf   : > { %v565_v18 = vpop.permute.xlu0 %564 }
 0x4c0   : > { %v570_v2 = vsel %vm336_vm3, %v565_v18, 0 }
 0x4c1   : > { %991 = vmatpush3.bf16.msra.mxu0 %v570_v2 }
 0x4c2   : > { %1002 = vmatprep.subr.bf16.mxu0 %v1100_v0 }
 0x4e0   : > { %v560_v19 = vpop.xlane.xlu1 %559 }
 0x4e1   : > { %1072 = vrcp.f32 %v560_v19 }
 0x4e2   : > { %1074 = vrcp.f32 %v679_v17 }
 0x4e4   : > { %v684_v21 = vpop.permute.xlu1 %683 }
 0x4e5   : > { %v689_v23 = vsel %vm336_vm3, %v684_v21, 0 }
 0x4eb   : > { %v1073_v20 = vpop.eup %1072 }
 0x4ec   : > { %v562_v22 = vmul.f32 %v1073_v20, %v1069_v9  ;;  %v1075_v25 = vpop.eup %1074 }
 0x4ed   : > { %v681_v26 = vmul.f32 %v1075_v25, %v1067_v4 }
 0x4ee   : > { %v563_v24 = vpack.c.bf16 %v562_v22, %v562_v22 }
 0x4ef   : > { %v682_v27 = vpack.c.bf16 %v681_v26, %v681_v26 }
 0x4f0   : > { %993 = vmatmul.mubr.msk.bf16.vlgmr.msra.gmra.mrb[8].mxu0 %vm272_vm1, %v563_v24 }
 0x4f1   : > { %1003 = vmatpush3.bf16.msra.mxu0 %v689_v23  ;;  %1004 = vmatprep.mubr.msk.bf16.mxu0 %vm1101_vm0, %v1100_v0 }
 0x4f8   : > { %1005 = vmatmul.mubr.msk.bf16.vlgmr.msra.gmra.mrb[12].mxu0 %vm272_vm1, %v682_v27 }
 0x58e   : > { %v487_v28 = vpop.f32.mrb[4].mxu0 }
 0x58f   : > { %v938_v29 = vpack.c.bf16 %v487_v28, %v487_v28  ;;  %v982_v30 = vpop.f32.mrb[5].mxu0 }
 0x590   : > { %v490_v31 = vpop.f32.mrb[6].mxu0 }
 0x591   : > { %497 = vrot.lane.b32.xlu1 %v938_v29, %s1114_s8  ;;  %v983_v32 = vpop.f32.mrb[7].mxu0 }
 0x5c3   : > { %v606_v34 = vpop.f32.mrb[8].mxu0 }
 0x5c4   : > { %v939_v36 = vpack.c.bf16 %v606_v34, %v606_v34  ;;  %v994_v37 = vpop.f32.mrb[9].mxu0 }
 0x5c5   : > { %v609_v38 = vpop.f32.mrb[10].mxu0 }
 0x5c6   : > { %616 = vrot.lane.b32.xlu0 %v939_v36, %s1115_s13  ;;  %v995_v39 = vpop.f32.mrb[11].mxu0 }
 0x5cb   : > { %v725_v40 = vpop.f32.mrb[12].mxu0 }
 0x5cc   : > { %v940_v41 = vpack.c.bf16 %v725_v40, %v725_v40  ;;  %v1006_v42 = vpop.f32.mrb[13].mxu0 }
 0x5cd   : > { %v728_v43 = vpop.f32.mrb[14].mxu0 }
 0x5ce   : > { %735 = vrot.lane.b32.xlu1 %v940_v41, %s1116_s14  ;;  %v1007_v44 = vpop.f32.mrb[15].mxu0 }
 0x603   : > { %v498_v45 = vpop.permute.xlu1 %497 }
 0x604   : > { %501 = vst.msk [vmem:[#allocation3] sm:$0xf] %vm500_vm6, %v498_v45 }
 0x638   : > { %v617_v46 = vpop.permute.xlu0 %616 }
 0x639   : > { %620 = vst.msk [vmem:[#allocation3] sm:$0xf] %vm619_vm7, %v617_v46 }
 0x640   : > { %v736_v0 = vpop.permute.xlu1 %735 }
 0x641   : > { %739 = vst.msk [vmem:[#allocation3] sm:$0xf] %vm738_vm8, %v736_v0 }
 0x648   : > { %v741_v47 = vld [vmem:[#allocation3] sm:$0xf] }
 0x649   : > { %1013 = vmatmul.mubr.msk.bf16.vlgmr.msra.gmra.mrb[16].mxu1 %vm260_vm5, %v741_v47 }
 0x71c   : > { %v796_v49 = vpop.f32.mrb[16].mxu1 }
 0x71d   : > { %v802_v50 = vadd.f32 %v796_v49, %v740_v48  ;;  %v1014_v51 = vpop.f32.mrb[17].mxu1 }
 0x71e   : > { %v799_v52 = vpop.f32.mrb[18].mxu1 }
 0x71f   : > { %803 = vst.msk [vmem:[#allocation2] sm:$0xff] %vm260_vm5, %v802_v50  ;;  %v1015_v53 = vpop.f32.mrb[19].mxu1 }
 0x726   : > { %v807_v55 = vld [vmem:[#allocation2] sm:$0xff] }
 0x727   : > { %v815_v57 = vadd.f32 %v935_v54, %v807_v55 }
 0x729   : > { %v817_v58 = vadd.f32 %v816_v56, %v815_v57 }
 0x72b   : > { %818 = vst.msk [vmem:[%s254_s27] sm:$0xff] %vm260_vm5, %v817_v58 }
 0x72c PF: > { %s14_s17 = sadd.s32 1, %s1098_s17   ;;  %s1272_s15 = smov %s1094_s16 }
 0x72d   : > { %p11_p5 = scmp.ge.s32.totalorder %s14_s17, 4   ;;  %s1273_s16 = smov %s1275_s18 }
 0x72f   :  { %13 = sbr.rel (!%p11_p5) target bundleno = 2 (0x2), region = 80 }

// kernel: run.17
= control target key start
LH: loop header
LB: loop body
LE: loop exit
PB: predicated region body
PF: predicated region fallthrough
CT: control target
= control target key end

     0   :  { %v108_v0 = vmov 0.0   ;;  %vm109_vm0 = vmmov 0   ;;  %vm39_vm1 = vcmask 261120   ;;  %vm83_vm2 = vcmask 195584   ;;  %s145_s1 = inlined_call_operand.vmem [shape: bf16[32,24], index: 1, kind: input, shape index: {}]   ;;  %s146_s0 = inlined_call_operand.vmem [shape: bf16[8,32], index: 0, kind: input, shape index: {}]   ;;  %s147_s2 = inlined_call_operand.vmem [shape: f32[1,24], index: 2, kind: input, shape index: {}]   ;;  %s148_s3 = inlined_call_operand.vmem [shape: f32[8,24], index: 3, kind: output, shape index: {}]  }
   0x1   :  { %96 = vmatprep.subr.bf16.mxu0 %v108_v0  ;;  %v106_v1 = vld [vmem:[%s145_s1] sm:$0xff]   ;;  %100 = vmatprep.mubr.msk.bf16.mxu0 %vm109_vm0, %v108_v0  ;;  %v107_v2 = vld [vmem:[%s145_s1 + $0x8] sm:$0xff]  }
   0x2   :  { %97 = vmatpush3.bf16.msra.mxu0 %v106_v1  ;;  %v15_v3 = vld [vmem:[%s146_s0] sm:$0xf] }
   0x3   :  { %98 = vmatprep.subr.bf16.mxu0 %v108_v0  ;;  %v89_v4 = vld [vmem:[%s147_s2] ss:$0 sm:$0xff] }
   0x6   :  { %99 = vmatpush3.bf16.msra.mxu0 %v107_v2 }
   0x9   :  { %101 = vmatmul.mubr.msk.bf16.vlgmr.msra.gmra.mrb[0].mxu0 %vm39_vm1, %v15_v3 }
  0xdc   :  { %v77_v5 = vpop.f32.mrb[0].mxu0 }
  0xdd   :  { %v78_v6 = vadd.f32 %v89_v4, %v77_v5  ;;  %v102_v7 = vpop.f32.mrb[1].mxu0 }
  0xde   :  { %v80_v8 = vpop.f32.mrb[2].mxu0 }
  0xdf   :  { %84 = vst.msk [vmem:[%s148_s3] sm:$0xff] %vm83_vm2, %v78_v6  ;;  %v103_v9 = vpop.f32.mrb[3].mxu0 }

// kernel: run.13
= control target key start
LH: loop header
LB: loop body
LE: loop exit
PB: predicated region body
PF: predicated region fallthrough
CT: control target
= control target key end

     0   :  { %vm35_vm0 = vcmask 261120   ;;  %v338_v15 = vmov 0.0   ;;  %vm339_vm1 = vmmov 0   ;;  %vm203_vm2 = vcmask 523264   ;;  %s444_s0 = inlined_call_operand.vmem [shape: f32[16,32], index: 0, kind: input, shape index: {}]   ;;  %s445_s3 = inlined_call_operand.vmem [shape: bf16[32,64], index: 3, kind: input, shape index: {}]   ;;  %s446_s1 = inlined_call_operand.vmem [shape: f32[1,32], index: 1, kind: input, shape index: {}]   ;;  %s447_s2 = inlined_call_operand.vmem [shape: f32[1,32], index: 2, kind: input, shape index: {}]   ;;  %s448_s5 = inlined_call_operand.vmem [shape: bf16[64,32], index: 5, kind: input, shape index: {}]   ;;  %s449_s4 = inlined_call_operand.vmem [shape: f32[1,64], index: 4, kind: input, shape index: {}]   ;;  %s450_s6 = inlined_call_operand.vmem [shape: f32[1,32], index: 6, kind: input, shape index: {}]   ;;  %s451_s7 = inlined_call_operand.vmem [shape: f32[16,32], index: 7, kind: output, shape index: {}]  }
   0x1   :  { %v383_v0 = vld [vmem:[%s444_s0] sm:$0xff]  ;;  %v388_v1 = vld [vmem:[%s444_s0 + $0x8] sm:$0xff]  ;;  %298 = vmatprep.subr.bf16.mxu0 %v338_v15  ;;  %81 = vst.msk [vmem:[#allocation2] sm:$0xff] %vm35_vm0, %v338_v15  ;;  %82 = vst.msk [vmem:[#allocation2 + $0x8] sm:$0xff] %vm35_vm0, %v338_v15  ;;  %306 = vmatprep.subr.bf16.mxu1 %v338_v15 }
   0x2   :  { %v36_v2 = vsel %vm35_vm0, %v383_v0, 0.0  ;;  %v39_v3 = vsel %vm35_vm0, %v388_v1, 0.0  ;;  %v320_v14 = vld [vmem:[%s445_s3] sm:$0xff]   ;;  %v321_v16 = vld [vmem:[%s445_s3 + $0x8] sm:$0xff]   ;;  %302 = vmatprep.mubr.msk.bf16.mxu0 %vm339_vm1, %v338_v15  ;;  %314 = vmatprep.mubr.msk.bf16.mxu1 %vm339_vm1, %v338_v15  ;;  %v324_v37 = vld [vmem:[%s448_s5 + $0x10] sm:$0xff]  }
   0x3   :  { %37 = vadd.xlane.f32.xlu0 %v36_v2  ;;  %299 = vmatpush3.bf16.msra.mxu0 %v320_v14  ;;  %v276_v25 = vld [vmem:[%s446_s1] ss:$0 sm:$0xff]  ;;  %v323_v36 = vld [vmem:[%s448_s5 + $0x8] sm:$0xff]   ;;  %v325_v38 = vld [vmem:[%s448_s5 + $0x18] sm:$0xff]  }
   0x4   :  { %300 = vmatprep.subr.bf16.mxu0 %v338_v15  ;;  %v277_v29 = vld [vmem:[%s447_s2] ss:$0 sm:$0xff] }
   0x5   :  { %v322_v35 = vld [vmem:[%s448_s5] sm:$0xff]  }
   0x6   :  { %307 = vmatpush3.bf16.msra.mxu1 %v322_v35  ;;  %v278_v39 = vld [vmem:[%s449_s4] ss:$0 sm:$0xff] }
   0x7   :  { %40 = vadd.xlane.f32.xlu0 %v39_v3  ;;  %301 = vmatpush3.bf16.msra.mxu0 %v321_v16 }
   0x8   :  { %308 = vmatprep.subr.bf16.mxu1 %v338_v15  ;;  %v168_v59 = vld [vmem:[#allocation2] sm:$0xff]  ;;  %v169_v61 = vld [vmem:[#allocation2 + $0x8] sm:$0xff] }
   0xa   :  { %309 = vmatpush3.bf16.msra.mxu1 %v323_v36 }
   0xb   :  { %310 = vmatprep.subr.bf16.mxu1 %v338_v15 }
   0xe   :  { %311 = vmatpush3.bf16.msra.mxu1 %v324_v37 }
   0xf   :  { %312 = vmatprep.subr.bf16.mxu1 %v338_v15 }
  0x12   :  { %313 = vmatpush3.bf16.msra.mxu1 %v325_v38 }
  0x90   :  { %v38_v4 = vpop.xlane.xlu0 %37 }
  0x91   :  { %v43_v5 = vmul.f32 0.03125, %v38_v4 }
  0x93   :  { %v45_v6 = vsub.f32 %v383_v0, %v43_v5  ;;  %v289_v5 = vld [vmem:[%s450_s6] ss:$0 sm:$0xff] }
  0x94   :  { %v41_v7 = vpop.xlane.xlu0 %40 }
  0x95   :  { %v44_v8 = vmul.f32 0.03125, %v41_v7  ;;  %v47_v9 = vmul.f32 %v45_v6, %v45_v6 }
  0x97   :  { %v46_v10 = vsub.f32 %v388_v1, %v44_v8  ;;  %v49_v11 = vsel %vm35_vm0, %v47_v9, 0.0 }
  0x98   :  { %50 = vadd.xlane.f32.xlu1 %v49_v11 }
  0x99   :  { %v48_v12 = vmul.f32 %v46_v10, %v46_v10 }
  0x9b   :  { %v52_v13 = vsel %vm35_vm0, %v48_v12, 0.0 }
  0x9c   :  { %53 = vadd.xlane.f32.xlu1 %v52_v13 }
 0x125   :  { %v51_v17 = vpop.xlane.xlu1 %50 }
 0x126   :  { %v55_v18 = vmul.f32 0.03125, %v51_v17 }
 0x128   :  { %v57_v19 = vadd.f32 1e-05, %v55_v18 }
 0x129   :  { %v54_v20 = vpop.xlane.xlu1 %53 }
 0x12a   :  { %326 = vrsqrt.f32 %v57_v19  ;;  %v56_v21 = vmul.f32 0.03125, %v54_v20 }
 0x12c   :  { %v58_v22 = vadd.f32 1e-05, %v56_v21 }
 0x12e   :  { %328 = vrsqrt.f32 %v58_v22 }
 0x134   :  { %v327_v23 = vpop.eup %326 }
 0x135   :  { %v61_v24 = vmul.f32 %v327_v23, %v45_v6 }
 0x137   :  { %v69_v27 = vmul.f32 %v276_v25, %v61_v24 }
 0x138   :  { %v329_v26 = vpop.eup %328 }
 0x139   :  { %v62_v28 = vmul.f32 %v329_v26, %v46_v10  ;;  %v77_v31 = vadd.f32 %v277_v29, %v69_v27 }
 0x13b   :  { %v70_v30 = vmul.f32 %v276_v25, %v62_v28 }
 0x13d   :  { %v78_v32 = vadd.f32 %v277_v29, %v70_v30 }
 0x13f   :  { %v79_v33 = vpack.c.bf16 %v78_v32, %v77_v31 }
 0x141   :  { %80 = vst.msk [vmem:[#allocation3] sm:$0xff] %vm35_vm0, %v79_v33 }
 0x148   :  { %v83_v34 = vld [vmem:[#allocation3] sm:$0xff] }
 0x149   :  { %303 = vmatmul.mubr.msk.bf16.vlgmr.msra.gmra.mrb[0].mxu0 %vm35_vm0, %v83_v34 }
 0x21c   :  { %v145_v40 = vpop.f32.mrb[0].mxu0 }
 0x21d   :  { %v146_v41 = vadd.f32 %v278_v39, %v145_v40  ;;  %v304_v42 = vpop.f32.mrb[1].mxu0 }
 0x21e   :  { %v148_v43 = vpop.f32.mrb[2].mxu0 }
 0x21f   :  { %v282_v44 = vmul.f32 -1.702, %v146_v41  ;;  %v149_v45 = vadd.f32 %v278_v39, %v148_v43  ;;  %v305_v46 = vpop.f32.mrb[3].mxu0 }
 0x221   :  { %v156_v47 = vmul.f32 1.442695, %v282_v44  ;;  %v283_v48 = vmul.f32 -1.702, %v149_v45 }
 0x223   :  { %330 = vpow2.f32 %v156_v47  ;;  %v158_v49 = vmul.f32 1.442695, %v283_v48 }
 0x225   :  { %332 = vpow2.f32 %v158_v49 }
 0x22d   :  { %v331_v50 = vpop.eup %330 }
 0x22e   :  { %v160_v51 = vadd.f32 1.0, %v331_v50 }
 0x22f   :  { %v333_v52 = vpop.eup %332 }
 0x230   :  { %334 = vrcp.f32 %v160_v51  ;;  %v161_v53 = vadd.f32 1.0, %v333_v52 }
 0x232   :  { %336 = vrcp.f32 %v161_v53 }
 0x23a   :  { %v335_v54 = vpop.eup %334 }
 0x23b   :  { %v166_v56 = vmul.f32 %v335_v54, %v146_v41 }
 0x23c   :  { %v337_v55 = vpop.eup %336 }
 0x23d   :  { %v167_v57 = vmul.f32 %v337_v55, %v149_v45 }
 0x23f   :  { %v170_v58 = vpack.c.bf16 %v167_v57, %v166_v56 }
 0x241   :  { %315 = vmatmul.mubr.msk.bf16.vlgmr.msra.gmra.mrb[0].mxu1 %vm203_vm2, %v170_v58 }
 0x314   :  { %v241_v60 = vpop.f32.mrb[0].mxu1 }
 0x315   :  { %v248_v62 = vadd.f32 %v241_v60, %v168_v59  ;;  %v316_v63 = vpop.f32.mrb[1].mxu1 }
 0x316   :  { %v244_v2 = vpop.f32.mrb[2].mxu1 }
 0x317   :  { %250 = vst.msk [vmem:[#allocation2] sm:$0xff] %vm35_vm0, %v248_v62  ;;  %v249_v3 = vadd.f32 %v244_v2, %v169_v61  ;;  %v317_v4 = vpop.f32.mrb[3].mxu1 }
 0x319   :  { %251 = vst.msk [vmem:[#allocation2 + $0x8] sm:$0xff] %vm35_vm0, %v249_v3 }
 0x31e   :  { %v255_v6 = vld [vmem:[#allocation2] sm:$0xff] }
 0x31f   :  { %v264_v7 = vadd.f32 %v289_v5, %v255_v6 }
 0x320   :  { %v256_v8 = vld [vmem:[#allocation2 + $0x8] sm:$0xff] }
 0x321   :  { %v268_v9 = vadd.f32 %v264_v7, %v383_v0  ;;  %v265_v10 = vadd.f32 %v289_v5, %v256_v8 }
 0x323   :  { %270 = vst.msk [vmem:[%s451_s7] sm:$0xff] %vm35_vm0, %v268_v9  ;;  %v269_v11 = vadd.f32 %v388_v1, %v265_v10 }
 0x325   :  { %271 = vst.msk [vmem:[%s451_s7 + $0x8] sm:$0xff] %vm35_vm0, %v269_v11 }

</bundles_post_ra>
